<compile_context>
chip_gen: v7x
topology: tpu7x:2x2x1
jax: 0.10.0
libtpu: 0.0.40
codegen_flags: <defaults>
</compile_context>

<pallas_src>
import functools

import jax
import jax.numpy as jnp
from jax.experimental import pallas as pl
from jax.experimental.pallas import tpu as pltpu


# ----------------------------- kernel helpers -------------------------------

def _layer_norm(x, ln_ref, eps=1e-5):
    """x: (T, D) f32; ln_ref: (2, D) = [gamma, beta] f32."""
    ln = ln_ref[...]
    gamma, beta = ln[0:1, :], ln[1:2, :]
    mu = jnp.mean(x, axis=-1, keepdims=True)
    var = jnp.mean(jnp.square(x - mu), axis=-1, keepdims=True)
    return (x - mu) * jax.lax.rsqrt(var + eps) * gamma + beta


def _mha(xq, qo_w_ref, qo_b_ref, ln_ref, k_ref, v_ref, keep, attn_ref, num_heads):
    """Q-projection + attention over precomputed head-major K/V + out-proj + add&norm.

    xq: (TQ, D) f32 queries / residual rows.
    qo_w_ref: (2, D, D) bf16 = [Wq, Wo]; qo_b_ref: (2, D) f32; ln_ref: (2, D) f32.
    k_ref, v_ref: (H, S_kv, hd) bf16 VMEM scratch (already head-major).
    keep: (TQ, S_kv) bool mask (True = keep).
    attn_ref: output Ref (H, TQ, S_kv).
    """
    TQ, D = xq.shape
    hd = D // num_heads
    scale = 1.0 / float(hd) ** 0.5
    qo_b = qo_b_ref[...]                                            # (2, D) f32

    # Q projection (bf16 MXU inputs, f32 accumulation); fold 1/sqrt(hd) into q
    # (TQ*D multiplies instead of H*TQ*S on the scores).
    q = jnp.dot(xq.astype(jnp.bfloat16), qo_w_ref[0],
                preferred_element_type=jnp.float32) + qo_b[0:1, :]
    q = (q * scale).astype(jnp.bfloat16)                            # (TQ, D)

    # Only the small (TQ, D) -> (H, TQ, hd) relayout is done per tile; the
    # S-length K/V side is already head-major in scratch.
    qh = jnp.stack([q[:, h * hd:(h + 1) * hd] for h in range(num_heads)], axis=0)
    kh = k_ref[...]                                                 # (H, S_kv, hd)
    vh = v_ref[...]

    # NOTE: contraction depth is hd, so QK^T is not MXU-roofline for hd < 128;
    # the memory-side fixes (resident K/V, bf16 prob writeback) dominate.
    s = jnp.einsum("hqd,hkd->hqk", qh, kh,
                   preferred_element_type=jnp.float32)              # (H, TQ, S_kv)
    s = jnp.where(keep, s, -1e9)        # exact masked_fill(mask == 0, -1e9)
    s = jnp.exp(s - jnp.max(s, axis=-1, keepdims=True))
    probs = s * pl.reciprocal(jnp.sum(s, axis=-1, keepdims=True), approx=True)

    attn_ref[...] = probs.astype(attn_ref.dtype)   # one head-batched store

    ctx = jnp.einsum("hqk,hkd->hqd", probs.astype(jnp.bfloat16), vh,
                     preferred_element_type=jnp.float32)            # (H, TQ, hd)
    ctx = jnp.concatenate([ctx[h] for h in range(num_heads)], axis=-1)  # (TQ, D)
    o = jnp.dot(ctx.astype(jnp.bfloat16), qo_w_ref[1],
                preferred_element_type=jnp.float32) + qo_b[1:2, :]
    return _layer_norm(xq + o, ln_ref)


# ------------------------------ pallas kernel -------------------------------

def decoder_layer_kernel(
    x_ref, enc_ref, smask_ref, cmask_ref,
    s_qo_w, s_kv_w, s_qo_b, s_kv_b, s_ln,
    c_qo_w, c_kv_w, c_qo_b, c_kv_b, c_ln,
    w1_ref, b1_ref, w2_ref, b2_ref, f_ln,
    out_ref, sattn_ref, cattn_ref,
    sk_ref, sv_ref, ck_ref, cv_ref,
    *, num_heads, q_tile,
):
    D = x_ref.shape[-1]
    hd = D // num_heads

    # Once per batch (qt axis is "arbitrary"): project self/cross K and V with a
    # single fused (S,D)x(D,2D) matmul each, store head-major bf16 in VMEM
    # scratch that persists across all query tiles of this batch.
    @pl.when(pl.program_id(1) == 0)
    def _fill_kv():
        def fill(src_ref, kv_w_ref, kv_b_ref, k_dst, v_dst):
            src = src_ref[...].astype(jnp.bfloat16)                 # cast once
            kv = jnp.dot(src, kv_w_ref[...],
                         preferred_element_type=jnp.float32) + kv_b_ref[...]
            for h in range(num_heads):                              # head-major
                lo = h * hd
                k_dst[h] = kv[:, lo:lo + hd].astype(jnp.bfloat16)
                v_dst[h] = kv[:, D + lo:D + lo + hd].astype(jnp.bfloat16)
        fill(x_ref, s_kv_w, s_kv_b, sk_ref, sv_ref)
        fill(enc_ref, c_kv_w, c_kv_b, ck_ref, cv_ref)

    row0 = pl.multiple_of(pl.program_id(1) * q_tile, q_tile)
    xq = x_ref[pl.ds(row0, q_tile), :]                              # (TQ, D) f32
    self_keep = smask_ref[...] != 0                                 # (TQ, S)
    cross_keep = cmask_ref[...] != 0                                # (TQ, S_enc)

    # 1) masked multi-head self-attention + add & norm
    y1 = _mha(xq, s_qo_w, s_qo_b, s_ln, sk_ref, sv_ref,
              self_keep, sattn_ref, num_heads)
    # 2) multi-head cross-attention over encoder output + add & norm
    y2 = _mha(y1, c_qo_w, c_qo_b, c_ln, ck_ref, cv_ref,
              cross_keep, cattn_ref, num_heads)
    # 3) position-wise feed-forward + add & norm (bf16 MXU inputs, f32 accum)
    # TODO(synk): for very large D*F on v7x, tile the FFN weights along F
    # (inner loop / emit_pipeline) instead of keeping full (D,F)/(F,D) resident.
    h = jnp.maximum(
        jnp.dot(y2.astype(jnp.bfloat16), w1_ref[...],
                preferred_element_type=jnp.float32) + b1_ref[...], 0.0)
    f = (jnp.dot(h.astype(jnp.bfloat16), w2_ref[...],
                 preferred_element_type=jnp.float32) + b2_ref[...])
    out_ref[...] = _layer_norm(y2 + f, f_ln)


# -------------------------------- wrapper ------------------------------------

def _pick_tile_and_vmem():
    """Per-generation defaults: (query tile, scoped-VMEM limit in bytes)."""
    kind = ""
    try:
        kind = jax.devices()[0].device_kind.lower()
    except Exception:
        pass
    if "v7" in kind or "7x" in kind:
        # v7x: 64 MiB physical VMEM -> smaller tile, leave compiler headroom.
        return 64, 56 * 1024 * 1024
    if any(t in kind for t in ("v4", "v5", "v6")):
        # 128 MiB physical VMEM; default scoped limit (16/32 MiB) is too small.
        return 128, 100 * 1024 * 1024
    return 128, None


def decoder_layer(x, enc_output, self_mask=None, cross_mask=None, params=None,
                  num_heads=4, q_tile=None, vmem_limit_bytes=None,
                  attn_weights_dtype=jnp.bfloat16):
    B, S, D = x.shape
    S_enc = enc_output.shape[1]
    F = params["w1"].shape[1]
    assert D % num_heads == 0
    hd = D // num_heads

    tq_def, vmem_def = _pick_tile_and_vmem()
    if q_tile is None:
        q_tile = tq_def
    if vmem_limit_bytes is None:
        vmem_limit_bytes = vmem_def
    TQ = min(q_tile, S)
    assert S % TQ == 0, "decoder seq length must be a multiple of the query tile"
    n_qt = S // TQ

    if self_mask is None:
        self_mask = jnp.ones((B, 1, S, S), jnp.float32)
    if cross_mask is None:
        cross_mask = jnp.ones((B, 1, S, S_enc), jnp.float32)

    bf16 = jnp.bfloat16

    def pack_attn(w, b):
        # [Wq, Wk, Wv, Wo] (4,D,D) -> bf16 [Wq,Wo] stack + fused bf16 [Wk|Wv].
        qo_w = jnp.stack([w[0], w[3]]).astype(bf16)                       # (2, D, D)
        kv_w = jnp.concatenate([w[1], w[2]], axis=1).astype(bf16)         # (D, 2D)
        qo_b = jnp.stack([b[0], b[3]]).astype(jnp.float32)                # (2, D)
        kv_b = jnp.concatenate([b[1], b[2]])[None, :].astype(jnp.float32)  # (1, 2D)
        return qo_w, kv_w, qo_b, kv_b

    s_qo_w, s_kv_w, s_qo_b, s_kv_b = pack_attn(params["self_w"], params["self_b"])
    c_qo_w, c_kv_w, c_qo_b, c_kv_b = pack_attn(params["cross_w"], params["cross_b"])
    w1 = params["w1"].astype(bf16)
    w2 = params["w2"].astype(bf16)

    # Masks shipped as bf16 (0/1 exact) and enc_output as bf16 (K/V-only source,
    # always cast before the MXU anyway): halves their HBM traffic / VMEM blocks.
    smask = self_mask.astype(bf16)
    cmask = cross_mask.astype(bf16)
    enc_bf = enc_output.astype(bf16)

    def const(shape):
        # Constant index_map -> block is never re-fetched across grid steps.
        # TODO(synk): single-buffer these (pipeline_mode=pl.Buffered(1)) to
        # reclaim a few MiB of VMEM on v7x once that knob is exercised here.
        return pl.BlockSpec(shape, lambda b, qt: (0,) * len(shape))

    in_specs = [
        pl.BlockSpec((None, S, D), lambda b, qt: (b, 0, 0)),                 # x
        pl.BlockSpec((None, S_enc, D), lambda b, qt: (b, 0, 0)),             # enc
        pl.BlockSpec((None, None, TQ, S), lambda b, qt: (b, 0, qt, 0)),      # smask
        pl.BlockSpec((None, None, TQ, S_enc), lambda b, qt: (b, 0, qt, 0)),  # cmask
        const((2, D, D)), const((D, 2 * D)), const((2, D)), const((1, 2 * D)), const((2, D)),
        const((2, D, D)), const((D, 2 * D)), const((2, D)), const((1, 2 * D)), const((2, D)),
        const((D, F)), const((1, F)), const((F, D)), const((1, D)), const((2, D)),
    ]
    out_specs = [
        pl.BlockSpec((None, TQ, D), lambda b, qt: (b, qt, 0)),
        pl.BlockSpec((None, num_heads, TQ, S), lambda b, qt: (b, 0, qt, 0)),
        pl.BlockSpec((None, num_heads, TQ, S_enc), lambda b, qt: (b, 0, qt, 0)),
    ]
    out_shape = (
        jax.ShapeDtypeStruct((B, S, D), jnp.float32),
        jax.ShapeDtypeStruct((B, num_heads, S, S), attn_weights_dtype),
        jax.ShapeDtypeStruct((B, num_heads, S, S_enc), attn_weights_dtype),
    )

    fn = pl.pallas_call(
        functools.partial(decoder_layer_kernel, num_heads=num_heads, q_tile=TQ),
        out_shape=out_shape,
        grid=(B, n_qt),
        in_specs=in_specs,
        out_specs=out_specs,
        scratch_shapes=[
            pltpu.VMEM((num_heads, S, hd), bf16),       # self K (head-major)
            pltpu.VMEM((num_heads, S, hd), bf16),       # self V
            pltpu.VMEM((num_heads, S_enc, hd), bf16),   # cross K
            pltpu.VMEM((num_heads, S_enc, hd), bf16),   # cross V
        ],
        compiler_params=pltpu.CompilerParams(
            # qt axis must be "arbitrary": VMEM K/V scratch carries state across it.
            dimension_semantics=("parallel", "arbitrary"),
            vmem_limit_bytes=vmem_limit_bytes,
        ),
    )
    return fn(
        x, enc_bf, smask, cmask,
        s_qo_w, s_kv_w, s_qo_b, s_kv_b, params["self_ln"],
        c_qo_w, c_kv_w, c_qo_b, c_kv_b, params["cross_ln"],
        w1, params["b1"], w2, params["b2"], params["ffn_ln"],
    )


# ----------------------------- pure-JAX reference ----------------------------

def reference(x, enc, smask, cmask, p, num_heads):
    def ln(t, g, b):
        mu = t.mean(-1, keepdims=True)
        var = ((t - mu) ** 2).mean(-1, keepdims=True)
        return g * (t - mu) / jnp.sqrt(var + 1e-5) + b

    def mha(q_in, k_in, v_in, w, b, lnp, mask):
        B, S, D = q_in.shape
        hd = D // num_heads
        q = q_in @ w[0] + b[0]
        k = k_in @ w[1] + b[1]
        v = v_in @ w[2] + b[2]

        def split(t):
            return t.reshape(B, S, num_heads, hd).transpose(0, 2, 1, 3)

        qh, kh, vh = split(q), split(k), split(v)
        scores = jnp.einsum("bhqd,bhkd->bhqk", qh, kh) / jnp.sqrt(float(hd))
        scores = jnp.where(mask != 0, scores, -1e9)
        probs = jax.nn.softmax(scores, axis=-1)
        ctx = jnp.einsum("bhqk,bhkd->bhqd", probs, vh)
        ctx = ctx.transpose(0, 2, 1, 3).reshape(B, S, D)
        o = ctx @ w[3] + b[3]
        return ln(q_in + o, lnp[0], lnp[1]), probs

    y1, sa = mha(x, x, x, p["self_w"], p["self_b"], p["self_ln"], smask)
    y2, ca = mha(y1, enc, enc, p["cross_w"], p["cross_b"], p["cross_ln"], cmask)
    h = jnp.maximum(y2 @ p["w1"] + p["b1"][0], 0.0)
    f = h @ p["w2"] + p["b2"][0]
    out = ln(y2 + f, p["ffn_ln"][0], p["ffn_ln"][1])
    return out, sa, ca


# ------------------------------------ main -----------------------------------

if __name__ == "__main__":
    B, S, D, H, F = 2, 8, 32, 4, 64

    key = jax.random.PRNGKey(0)
    ks = jax.random.split(key, 12)
    scale = 0.05

    params = {
        "self_w": scale * jax.random.normal(ks[0], (4, D, D), jnp.float32),
        "self_b": scale * jax.random.normal(ks[1], (4, D), jnp.float32),
        "self_ln": jnp.stack([jnp.ones((D,)), jnp.zeros((D,))]).astype(jnp.float32),
        "cross_w": scale * jax.random.normal(ks[2], (4, D, D), jnp.float32),
        "cross_b": scale * jax.random.normal(ks[3], (4, D), jnp.float32),
        "cross_ln": jnp.stack([jnp.ones((D,)), jnp.zeros((D,))]).astype(jnp.float32),
        "w1": scale * jax.random.normal(ks[4], (D, F), jnp.float32),
        "b1": scale * jax.random.normal(ks[5], (1, F), jnp.float32),
        "w2": scale * jax.random.normal(ks[6], (F, D), jnp.float32),
        "b2": scale * jax.random.normal(ks[7], (1, D), jnp.float32),
        "ffn_ln": jnp.stack([jnp.ones((D,)), jnp.zeros((D,))]).astype(jnp.float32),
    }

    x = jax.random.normal(ks[8], (B, S, D), jnp.float32)
    enc = jax.random.normal(ks[9], (B, S, D), jnp.float32)
    # causal mask for self-attention, full mask for cross-attention
    causal = jnp.tril(jnp.ones((S, S), jnp.float32))
    self_mask = jnp.broadcast_to(causal[None, None], (B, 1, S, S))
    cross_mask = jnp.ones((B, 1, S, S), jnp.float32)

    out, self_w, cross_w = decoder_layer(x, enc, self_mask, cross_mask, params, H)
    jax.block_until_ready((out, self_w, cross_w))

    ref_out, ref_sw, ref_cw = reference(x, enc, self_mask, cross_mask, params, H)
    # Tolerances: matmuls use bf16 inputs with f32 accumulation, attention-prob
    # outputs are emitted in bf16, softmax denominator uses the approx EUP recip.
    assert jnp.allclose(out, ref_out, atol=3e-2, rtol=3e-2), "output mismatch"
    assert jnp.allclose(self_w.astype(jnp.float32), ref_sw,
                        atol=3e-2, rtol=3e-2), "self-attn mismatch"
    assert jnp.allclose(cross_w.astype(jnp.float32), ref_cw,
                        atol=3e-2, rtol=3e-2), "cross-attn mismatch"

    print("KERNEL_OK")
</pallas_src>

<mosaic_0001>
module attributes {stable_mosaic.version = 11 : i64} {
  func.func @decoder_layer_kernel(%arg0: i32, %arg1: i32, %arg2: memref<1x8x32xf32, #tpu.memory_space<vmem>>, %arg3: memref<1x8x32xbf16, #tpu.memory_space<vmem>>, %arg4: memref<1x1x8x8xbf16, #tpu.memory_space<vmem>>, %arg5: memref<1x1x8x8xbf16, #tpu.memory_space<vmem>>, %arg6: memref<2x32x32xbf16, #tpu.memory_space<vmem>>, %arg7: memref<32x64xbf16, #tpu.memory_space<vmem>>, %arg8: memref<2x32xf32, #tpu.memory_space<vmem>>, %arg9: memref<1x64xf32, #tpu.memory_space<vmem>>, %arg10: memref<2x32xf32, #tpu.memory_space<vmem>>, %arg11: memref<2x32x32xbf16, #tpu.memory_space<vmem>>, %arg12: memref<32x64xbf16, #tpu.memory_space<vmem>>, %arg13: memref<2x32xf32, #tpu.memory_space<vmem>>, %arg14: memref<1x64xf32, #tpu.memory_space<vmem>>, %arg15: memref<2x32xf32, #tpu.memory_space<vmem>>, %arg16: memref<32x64xbf16, #tpu.memory_space<vmem>>, %arg17: memref<1x64xf32, #tpu.memory_space<vmem>>, %arg18: memref<64x32xbf16, #tpu.memory_space<vmem>>, %arg19: memref<1x32xf32, #tpu.memory_space<vmem>>, %arg20: memref<2x32xf32, #tpu.memory_space<vmem>>, %arg21: memref<1x8x32xf32, #tpu.memory_space<vmem>>, %arg22: memref<1x4x8x8xbf16, #tpu.memory_space<vmem>>, %arg23: memref<1x4x8x8xbf16, #tpu.memory_space<vmem>>, %arg24: memref<4x8x8xbf16, #tpu.memory_space<vmem>>, %arg25: memref<4x8x8xbf16, #tpu.memory_space<vmem>>, %arg26: memref<4x8x8xbf16, #tpu.memory_space<vmem>>, %arg27: memref<4x8x8xbf16, #tpu.memory_space<vmem>>) attributes {dimension_semantics = [#tpu.dimension_semantics<parallel>, #tpu.dimension_semantics<arbitrary>], iteration_bounds = array<i64: 2, 1>, scalar_prefetch = 0 : i64, scratch_operands = 4 : i64, tpu.core_type = #tpu.core_type<tc>, window_params = [{transform_indices = @transform_0, window_bounds = array<i64: 1, 8, 32>}, {transform_indices = @transform_1, window_bounds = array<i64: 1, 8, 32>}, {transform_indices = @transform_2, window_bounds = array<i64: 1, 1, 8, 8>}, {transform_indices = @transform_3, window_bounds = array<i64: 1, 1, 8, 8>}, {pipeline_mode = #tpu.pipeline_mode<synchronous>, transform_indices = @transform_4, window_bounds = array<i64: 2, 32, 32>}, {pipeline_mode = #tpu.pipeline_mode<synchronous>, transform_indices = @transform_5, window_bounds = array<i64: 32, 64>}, {pipeline_mode = #tpu.pipeline_mode<synchronous>, transform_indices = @transform_6, window_bounds = array<i64: 2, 32>}, {pipeline_mode = #tpu.pipeline_mode<synchronous>, transform_indices = @transform_7, window_bounds = array<i64: 1, 64>}, {pipeline_mode = #tpu.pipeline_mode<synchronous>, transform_indices = @transform_8, window_bounds = array<i64: 2, 32>}, {pipeline_mode = #tpu.pipeline_mode<synchronous>, transform_indices = @transform_9, window_bounds = array<i64: 2, 32, 32>}, {pipeline_mode = #tpu.pipeline_mode<synchronous>, transform_indices = @transform_10, window_bounds = array<i64: 32, 64>}, {pipeline_mode = #tpu.pipeline_mode<synchronous>, transform_indices = @transform_11, window_bounds = array<i64: 2, 32>}, {pipeline_mode = #tpu.pipeline_mode<synchronous>, transform_indices = @transform_12, window_bounds = array<i64: 1, 64>}, {pipeline_mode = #tpu.pipeline_mode<synchronous>, transform_indices = @transform_13, window_bounds = array<i64: 2, 32>}, {pipeline_mode = #tpu.pipeline_mode<synchronous>, transform_indices = @transform_14, window_bounds = array<i64: 32, 64>}, {pipeline_mode = #tpu.pipeline_mode<synchronous>, transform_indices = @transform_15, window_bounds = array<i64: 1, 64>}, {pipeline_mode = #tpu.pipeline_mode<synchronous>, transform_indices = @transform_16, window_bounds = array<i64: 64, 32>}, {pipeline_mode = #tpu.pipeline_mode<synchronous>, transform_indices = @transform_17, window_bounds = array<i64: 1, 32>}, {pipeline_mode = #tpu.pipeline_mode<synchronous>, transform_indices = @transform_18, window_bounds = array<i64: 2, 32>}, {transform_indices = @transform_19, window_bounds = array<i64: 1, 8, 32>}, {transform_indices = @transform_20, window_bounds = array<i64: 1, 4, 8, 8>}, {transform_indices = @transform_21, window_bounds = array<i64: 1, 4, 8, 8>}]} {
    %c0_i32 = arith.constant 0 : i32
    %0 = arith.cmpi eq, %arg1, %c0_i32 : i32
    %1 = arith.extui %0 : i1 to i32
    %c0_i32_0 = arith.constant 0 : i32
    %2 = arith.cmpi ne, %1, %c0_i32_0 : i32
    scf.if %2 {
      %c0_97 = arith.constant 0 : index
      %c0_98 = arith.constant 0 : index
      %c0_99 = arith.constant 0 : index
      %229 = vector.load %arg2[%c0_97, %c0_98, %c0_99] : memref<1x8x32xf32, #tpu.memory_space<vmem>>, vector<1x8x32xf32>
      %230 = vector.shape_cast %229 : vector<1x8x32xf32> to vector<8x32xf32>
      %231 = arith.truncf %230 : vector<8x32xf32> to vector<8x32xbf16>
      %c0_100 = arith.constant 0 : index
      %c0_101 = arith.constant 0 : index
      %232 = vector.load %arg7[%c0_100, %c0_101] : memref<32x64xbf16, #tpu.memory_space<vmem>>, vector<32x64xbf16>
      %cst_102 = arith.constant dense<0.000000e+00> : vector<8x64xf32>
      %233 = tpu.matmul %231, %232, %cst_102 {dimension_numbers = #tpu.dot_dimension_numbers<[1], [0], [0], [1], [0, 0, 1, 1], [], []>} : vector<8x32xbf16>, vector<32x64xbf16>, vector<8x64xf32> -> vector<8x64xf32>
      %c0_103 = arith.constant 0 : index
      %c0_104 = arith.constant 0 : index
      %234 = vector.load %arg9[%c0_103, %c0_104] : memref<1x64xf32, #tpu.memory_space<vmem>>, vector<1x64xf32>
      %235 = vector.broadcast %234 : vector<1x64xf32> to vector<8x64xf32>
      %236 = arith.addf %233, %235 : vector<8x64xf32>
      %237 = vector.extract_strided_slice %236 {offsets = [0, 0], sizes = [8, 8], strides = [1, 1]} : vector<8x64xf32> to vector<8x8xf32>
      %238 = arith.truncf %237 : vector<8x8xf32> to vector<8x8xbf16>
      %c0_105 = arith.constant 0 : index
      %c0_106 = arith.constant 0 : index
      %c0_107 = arith.constant 0 : index
      %239 = vector.load %arg24[%c0_105, %c0_106, %c0_107] : memref<4x8x8xbf16, #tpu.memory_space<vmem>>, vector<1x8x8xbf16>
      %240 = vector.shape_cast %239 : vector<1x8x8xbf16> to vector<8x8xbf16>
      %241 = vector.shape_cast %238 : vector<8x8xbf16> to vector<1x8x8xbf16>
      tpu.vector_store %arg24[%c0_105, %c0_106, %c0_107], %241 {strides = array<i32>} : memref<4x8x8xbf16, #tpu.memory_space<vmem>>, vector<1x8x8xbf16>,
      %242 = vector.extract_strided_slice %236 {offsets = [0, 32], sizes = [8, 8], strides = [1, 1]} : vector<8x64xf32> to vector<8x8xf32>
      %243 = arith.truncf %242 : vector<8x8xf32> to vector<8x8xbf16>
      %c0_108 = arith.constant 0 : index
      %c0_109 = arith.constant 0 : index
      %c0_110 = arith.constant 0 : index
      %244 = vector.load %arg25[%c0_108, %c0_109, %c0_110] : memref<4x8x8xbf16, #tpu.memory_space<vmem>>, vector<1x8x8xbf16>
      %245 = vector.shape_cast %244 : vector<1x8x8xbf16> to vector<8x8xbf16>
      %246 = vector.shape_cast %243 : vector<8x8xbf16> to vector<1x8x8xbf16>
      tpu.vector_store %arg25[%c0_108, %c0_109, %c0_110], %246 {strides = array<i32>} : memref<4x8x8xbf16, #tpu.memory_space<vmem>>, vector<1x8x8xbf16>,
      %247 = vector.extract_strided_slice %236 {offsets = [0, 8], sizes = [8, 8], strides = [1, 1]} : vector<8x64xf32> to vector<8x8xf32>
      %248 = arith.truncf %247 : vector<8x8xf32> to vector<8x8xbf16>
      %c1_111 = arith.constant 1 : index
      %c0_112 = arith.constant 0 : index
      %c0_113 = arith.constant 0 : index
      %249 = vector.load %arg24[%c1_111, %c0_112, %c0_113] : memref<4x8x8xbf16, #tpu.memory_space<vmem>>, vector<1x8x8xbf16>
      %250 = vector.shape_cast %249 : vector<1x8x8xbf16> to vector<8x8xbf16>
      %251 = vector.shape_cast %248 : vector<8x8xbf16> to vector<1x8x8xbf16>
      tpu.vector_store %arg24[%c1_111, %c0_112, %c0_113], %251 {strides = array<i32>} : memref<4x8x8xbf16, #tpu.memory_space<vmem>>, vector<1x8x8xbf16>,
      %252 = vector.extract_strided_slice %236 {offsets = [0, 40], sizes = [8, 8], strides = [1, 1]} : vector<8x64xf32> to vector<8x8xf32>
      %253 = arith.truncf %252 : vector<8x8xf32> to vector<8x8xbf16>
      %c1_114 = arith.constant 1 : index
      %c0_115 = arith.constant 0 : index
      %c0_116 = arith.constant 0 : index
      %254 = vector.load %arg25[%c1_114, %c0_115, %c0_116] : memref<4x8x8xbf16, #tpu.memory_space<vmem>>, vector<1x8x8xbf16>
      %255 = vector.shape_cast %254 : vector<1x8x8xbf16> to vector<8x8xbf16>
      %256 = vector.shape_cast %253 : vector<8x8xbf16> to vector<1x8x8xbf16>
      tpu.vector_store %arg25[%c1_114, %c0_115, %c0_116], %256 {strides = array<i32>} : memref<4x8x8xbf16, #tpu.memory_space<vmem>>, vector<1x8x8xbf16>,
      %257 = vector.extract_strided_slice %236 {offsets = [0, 16], sizes = [8, 8], strides = [1, 1]} : vector<8x64xf32> to vector<8x8xf32>
      %258 = arith.truncf %257 : vector<8x8xf32> to vector<8x8xbf16>
      %c2 = arith.constant 2 : index
      %c0_117 = arith.constant 0 : index
      %c0_118 = arith.constant 0 : index
      %259 = vector.load %arg24[%c2, %c0_117, %c0_118] : memref<4x8x8xbf16, #tpu.memory_space<vmem>>, vector<1x8x8xbf16>
      %260 = vector.shape_cast %259 : vector<1x8x8xbf16> to vector<8x8xbf16>
      %261 = vector.shape_cast %258 : vector<8x8xbf16> to vector<1x8x8xbf16>
      tpu.vector_store %arg24[%c2, %c0_117, %c0_118], %261 {strides = array<i32>} : memref<4x8x8xbf16, #tpu.memory_space<vmem>>, vector<1x8x8xbf16>,
      %262 = vector.extract_strided_slice %236 {offsets = [0, 48], sizes = [8, 8], strides = [1, 1]} : vector<8x64xf32> to vector<8x8xf32>
      %263 = arith.truncf %262 : vector<8x8xf32> to vector<8x8xbf16>
      %c2_119 = arith.constant 2 : index
      %c0_120 = arith.constant 0 : index
      %c0_121 = arith.constant 0 : index
      %264 = vector.load %arg25[%c2_119, %c0_120, %c0_121] : memref<4x8x8xbf16, #tpu.memory_space<vmem>>, vector<1x8x8xbf16>
      %265 = vector.shape_cast %264 : vector<1x8x8xbf16> to vector<8x8xbf16>
      %266 = vector.shape_cast %263 : vector<8x8xbf16> to vector<1x8x8xbf16>
      tpu.vector_store %arg25[%c2_119, %c0_120, %c0_121], %266 {strides = array<i32>} : memref<4x8x8xbf16, #tpu.memory_space<vmem>>, vector<1x8x8xbf16>,
      %267 = vector.extract_strided_slice %236 {offsets = [0, 24], sizes = [8, 8], strides = [1, 1]} : vector<8x64xf32> to vector<8x8xf32>
      %268 = arith.truncf %267 : vector<8x8xf32> to vector<8x8xbf16>
      %c3 = arith.constant 3 : index
      %c0_122 = arith.constant 0 : index
      %c0_123 = arith.constant 0 : index
      %269 = vector.load %arg24[%c3, %c0_122, %c0_123] : memref<4x8x8xbf16, #tpu.memory_space<vmem>>, vector<1x8x8xbf16>
      %270 = vector.shape_cast %269 : vector<1x8x8xbf16> to vector<8x8xbf16>
      %271 = vector.shape_cast %268 : vector<8x8xbf16> to vector<1x8x8xbf16>
      tpu.vector_store %arg24[%c3, %c0_122, %c0_123], %271 {strides = array<i32>} : memref<4x8x8xbf16, #tpu.memory_space<vmem>>, vector<1x8x8xbf16>,
      %272 = vector.extract_strided_slice %236 {offsets = [0, 56], sizes = [8, 8], strides = [1, 1]} : vector<8x64xf32> to vector<8x8xf32>
      %273 = arith.truncf %272 : vector<8x8xf32> to vector<8x8xbf16>
      %c3_124 = arith.constant 3 : index
      %c0_125 = arith.constant 0 : index
      %c0_126 = arith.constant 0 : index
      %274 = vector.load %arg25[%c3_124, %c0_125, %c0_126] : memref<4x8x8xbf16, #tpu.memory_space<vmem>>, vector<1x8x8xbf16>
      %275 = vector.shape_cast %274 : vector<1x8x8xbf16> to vector<8x8xbf16>
      %276 = vector.shape_cast %273 : vector<8x8xbf16> to vector<1x8x8xbf16>
      tpu.vector_store %arg25[%c3_124, %c0_125, %c0_126], %276 {strides = array<i32>} : memref<4x8x8xbf16, #tpu.memory_space<vmem>>, vector<1x8x8xbf16>,
      %c0_127 = arith.constant 0 : index
      %c0_128 = arith.constant 0 : index
      %c0_129 = arith.constant 0 : index
      %277 = vector.load %arg3[%c0_127, %c0_128, %c0_129] : memref<1x8x32xbf16, #tpu.memory_space<vmem>>, vector<1x8x32xbf16>
      %278 = vector.shape_cast %277 : vector<1x8x32xbf16> to vector<8x32xbf16>
      %c0_130 = arith.constant 0 : index
      %c0_131 = arith.constant 0 : index
      %279 = vector.load %arg12[%c0_130, %c0_131] : memref<32x64xbf16, #tpu.memory_space<vmem>>, vector<32x64xbf16>
      %cst_132 = arith.constant dense<0.000000e+00> : vector<8x64xf32>
      %280 = tpu.matmul %278, %279, %cst_132 {dimension_numbers = #tpu.dot_dimension_numbers<[1], [0], [0], [1], [0, 0, 1, 1], [], []>} : vector<8x32xbf16>, vector<32x64xbf16>, vector<8x64xf32> -> vector<8x64xf32>
      %c0_133 = arith.constant 0 : index
      %c0_134 = arith.constant 0 : index
      %281 = vector.load %arg14[%c0_133, %c0_134] : memref<1x64xf32, #tpu.memory_space<vmem>>, vector<1x64xf32>
      %282 = vector.broadcast %281 : vector<1x64xf32> to vector<8x64xf32>
      %283 = arith.addf %280, %282 : vector<8x64xf32>
      %284 = vector.extract_strided_slice %283 {offsets = [0, 0], sizes = [8, 8], strides = [1, 1]} : vector<8x64xf32> to vector<8x8xf32>
      %285 = arith.truncf %284 : vector<8x8xf32> to vector<8x8xbf16>
      %c0_135 = arith.constant 0 : index
      %c0_136 = arith.constant 0 : index
      %c0_137 = arith.constant 0 : index
      %286 = vector.load %arg26[%c0_135, %c0_136, %c0_137] : memref<4x8x8xbf16, #tpu.memory_space<vmem>>, vector<1x8x8xbf16>
      %287 = vector.shape_cast %286 : vector<1x8x8xbf16> to vector<8x8xbf16>
      %288 = vector.shape_cast %285 : vector<8x8xbf16> to vector<1x8x8xbf16>
      tpu.vector_store %arg26[%c0_135, %c0_136, %c0_137], %288 {strides = array<i32>} : memref<4x8x8xbf16, #tpu.memory_space<vmem>>, vector<1x8x8xbf16>,
      %289 = vector.extract_strided_slice %283 {offsets = [0, 32], sizes = [8, 8], strides = [1, 1]} : vector<8x64xf32> to vector<8x8xf32>
      %290 = arith.truncf %289 : vector<8x8xf32> to vector<8x8xbf16>
      %c0_138 = arith.constant 0 : index
      %c0_139 = arith.constant 0 : index
      %c0_140 = arith.constant 0 : index
      %291 = vector.load %arg27[%c0_138, %c0_139, %c0_140] : memref<4x8x8xbf16, #tpu.memory_space<vmem>>, vector<1x8x8xbf16>
      %292 = vector.shape_cast %291 : vector<1x8x8xbf16> to vector<8x8xbf16>
      %293 = vector.shape_cast %290 : vector<8x8xbf16> to vector<1x8x8xbf16>
      tpu.vector_store %arg27[%c0_138, %c0_139, %c0_140], %293 {strides = array<i32>} : memref<4x8x8xbf16, #tpu.memory_space<vmem>>, vector<1x8x8xbf16>,
      %294 = vector.extract_strided_slice %283 {offsets = [0, 8], sizes = [8, 8], strides = [1, 1]} : vector<8x64xf32> to vector<8x8xf32>
      %295 = arith.truncf %294 : vector<8x8xf32> to vector<8x8xbf16>
      %c1_141 = arith.constant 1 : index
      %c0_142 = arith.constant 0 : index
      %c0_143 = arith.constant 0 : index
      %296 = vector.load %arg26[%c1_141, %c0_142, %c0_143] : memref<4x8x8xbf16, #tpu.memory_space<vmem>>, vector<1x8x8xbf16>
      %297 = vector.shape_cast %296 : vector<1x8x8xbf16> to vector<8x8xbf16>
      %298 = vector.shape_cast %295 : vector<8x8xbf16> to vector<1x8x8xbf16>
      tpu.vector_store %arg26[%c1_141, %c0_142, %c0_143], %298 {strides = array<i32>} : memref<4x8x8xbf16, #tpu.memory_space<vmem>>, vector<1x8x8xbf16>,
      %299 = vector.extract_strided_slice %283 {offsets = [0, 40], sizes = [8, 8], strides = [1, 1]} : vector<8x64xf32> to vector<8x8xf32>
      %300 = arith.truncf %299 : vector<8x8xf32> to vector<8x8xbf16>
      %c1_144 = arith.constant 1 : index
      %c0_145 = arith.constant 0 : index
      %c0_146 = arith.constant 0 : index
      %301 = vector.load %arg27[%c1_144, %c0_145, %c0_146] : memref<4x8x8xbf16, #tpu.memory_space<vmem>>, vector<1x8x8xbf16>
      %302 = vector.shape_cast %301 : vector<1x8x8xbf16> to vector<8x8xbf16>
      %303 = vector.shape_cast %300 : vector<8x8xbf16> to vector<1x8x8xbf16>
      tpu.vector_store %arg27[%c1_144, %c0_145, %c0_146], %303 {strides = array<i32>} : memref<4x8x8xbf16, #tpu.memory_space<vmem>>, vector<1x8x8xbf16>,
      %304 = vector.extract_strided_slice %283 {offsets = [0, 16], sizes = [8, 8], strides = [1, 1]} : vector<8x64xf32> to vector<8x8xf32>
      %305 = arith.truncf %304 : vector<8x8xf32> to vector<8x8xbf16>
      %c2_147 = arith.constant 2 : index
      %c0_148 = arith.constant 0 : index
      %c0_149 = arith.constant 0 : index
      %306 = vector.load %arg26[%c2_147, %c0_148, %c0_149] : memref<4x8x8xbf16, #tpu.memory_space<vmem>>, vector<1x8x8xbf16>
      %307 = vector.shape_cast %306 : vector<1x8x8xbf16> to vector<8x8xbf16>
      %308 = vector.shape_cast %305 : vector<8x8xbf16> to vector<1x8x8xbf16>
      tpu.vector_store %arg26[%c2_147, %c0_148, %c0_149], %308 {strides = array<i32>} : memref<4x8x8xbf16, #tpu.memory_space<vmem>>, vector<1x8x8xbf16>,
      %309 = vector.extract_strided_slice %283 {offsets = [0, 48], sizes = [8, 8], strides = [1, 1]} : vector<8x64xf32> to vector<8x8xf32>
      %310 = arith.truncf %309 : vector<8x8xf32> to vector<8x8xbf16>
      %c2_150 = arith.constant 2 : index
      %c0_151 = arith.constant 0 : index
      %c0_152 = arith.constant 0 : index
      %311 = vector.load %arg27[%c2_150, %c0_151, %c0_152] : memref<4x8x8xbf16, #tpu.memory_space<vmem>>, vector<1x8x8xbf16>
      %312 = vector.shape_cast %311 : vector<1x8x8xbf16> to vector<8x8xbf16>
      %313 = vector.shape_cast %310 : vector<8x8xbf16> to vector<1x8x8xbf16>
      tpu.vector_store %arg27[%c2_150, %c0_151, %c0_152], %313 {strides = array<i32>} : memref<4x8x8xbf16, #tpu.memory_space<vmem>>, vector<1x8x8xbf16>,
      %314 = vector.extract_strided_slice %283 {offsets = [0, 24], sizes = [8, 8], strides = [1, 1]} : vector<8x64xf32> to vector<8x8xf32>
      %315 = arith.truncf %314 : vector<8x8xf32> to vector<8x8xbf16>
      %c3_153 = arith.constant 3 : index
      %c0_154 = arith.constant 0 : index
      %c0_155 = arith.constant 0 : index
      %316 = vector.load %arg26[%c3_153, %c0_154, %c0_155] : memref<4x8x8xbf16, #tpu.memory_space<vmem>>, vector<1x8x8xbf16>
      %317 = vector.shape_cast %316 : vector<1x8x8xbf16> to vector<8x8xbf16>
      %318 = vector.shape_cast %315 : vector<8x8xbf16> to vector<1x8x8xbf16>
      tpu.vector_store %arg26[%c3_153, %c0_154, %c0_155], %318 {strides = array<i32>} : memref<4x8x8xbf16, #tpu.memory_space<vmem>>, vector<1x8x8xbf16>,
      %319 = vector.extract_strided_slice %283 {offsets = [0, 56], sizes = [8, 8], strides = [1, 1]} : vector<8x64xf32> to vector<8x8xf32>
      %320 = arith.truncf %319 : vector<8x8xf32> to vector<8x8xbf16>
      %c3_156 = arith.constant 3 : index
      %c0_157 = arith.constant 0 : index
      %c0_158 = arith.constant 0 : index
      %321 = vector.load %arg27[%c3_156, %c0_157, %c0_158] : memref<4x8x8xbf16, #tpu.memory_space<vmem>>, vector<1x8x8xbf16>
      %322 = vector.shape_cast %321 : vector<1x8x8xbf16> to vector<8x8xbf16>
      %323 = vector.shape_cast %320 : vector<8x8xbf16> to vector<1x8x8xbf16>
      tpu.vector_store %arg27[%c3_156, %c0_157, %c0_158], %323 {strides = array<i32>} : memref<4x8x8xbf16, #tpu.memory_space<vmem>>, vector<1x8x8xbf16>,
    } else {
    }
    %c8_i32 = arith.constant 8 : i32
    %3 = arith.muli %arg1, %c8_i32 : i32
    %4 = tpu.assume_multiple %3, 8 : i32
    %c0 = arith.constant 0 : index
    %5 = arith.index_cast %4 : i32 to index
    %c0_1 = arith.constant 0 : index
    %6 = vector.load %arg2[%c0, %5, %c0_1] : memref<1x8x32xf32, #tpu.memory_space<vmem>>, vector<1x8x32xf32>
    %7 = vector.shape_cast %6 : vector<1x8x32xf32> to vector<8x32xf32>
    %c0_2 = arith.constant 0 : index
    %c0_3 = arith.constant 0 : index
    %c0_4 = arith.constant 0 : index
    %c0_5 = arith.constant 0 : index
    %8 = vector.load %arg4[%c0_2, %c0_3, %c0_4, %c0_5] : memref<1x1x8x8xbf16, #tpu.memory_space<vmem>>, vector<1x1x8x8xbf16>
    %9 = vector.shape_cast %8 : vector<1x1x8x8xbf16> to vector<8x8xbf16>
    %cst = arith.constant 0.000000e+00 : bf16
    %10 = vector.broadcast %cst : bf16 to vector<8x8xbf16>
    %11 = arith.cmpf one, %9, %10 : vector<8x8xbf16>
    %c0_6 = arith.constant 0 : index
    %c0_7 = arith.constant 0 : index
    %c0_8 = arith.constant 0 : index
    %c0_9 = arith.constant 0 : index
    %12 = vector.load %arg5[%c0_6, %c0_7, %c0_8, %c0_9] : memref<1x1x8x8xbf16, #tpu.memory_space<vmem>>, vector<1x1x8x8xbf16>
    %13 = vector.shape_cast %12 : vector<1x1x8x8xbf16> to vector<8x8xbf16>
    %cst_10 = arith.constant 0.000000e+00 : bf16
    %14 = vector.broadcast %cst_10 : bf16 to vector<8x8xbf16>
    %15 = arith.cmpf one, %13, %14 : vector<8x8xbf16>
    %c0_11 = arith.constant 0 : index
    %c0_12 = arith.constant 0 : index
    %16 = vector.load %arg8[%c0_11, %c0_12] : memref<2x32xf32, #tpu.memory_space<vmem>>, vector<2x32xf32>
    %17 = arith.truncf %7 : vector<8x32xf32> to vector<8x32xbf16>
    %c0_13 = arith.constant 0 : index
    %c0_14 = arith.constant 0 : index
    %c0_15 = arith.constant 0 : index
    %18 = vector.load %arg6[%c0_13, %c0_14, %c0_15] : memref<2x32x32xbf16, #tpu.memory_space<vmem>>, vector<1x32x32xbf16>
    %19 = vector.shape_cast %18 : vector<1x32x32xbf16> to vector<32x32xbf16>
    %cst_16 = arith.constant dense<0.000000e+00> : vector<8x32xf32>
    %20 = tpu.matmul %17, %19, %cst_16 {dimension_numbers = #tpu.dot_dimension_numbers<[1], [0], [0], [1], [0, 0, 1, 1], [], []>} : vector<8x32xbf16>, vector<32x32xbf16>, vector<8x32xf32> -> vector<8x32xf32>
    %21 = vector.extract_strided_slice %16 {offsets = [0, 0], sizes = [1, 32], strides = [1, 1]} : vector<2x32xf32> to vector<1x32xf32>
    %22 = vector.broadcast %21 : vector<1x32xf32> to vector<8x32xf32>
    %23 = arith.addf %20, %22 : vector<8x32xf32>
    %cst_17 = arith.constant 0.353553385 : f32
    %24 = vector.broadcast %cst_17 : f32 to vector<8x32xf32>
    %25 = arith.mulf %23, %24 : vector<8x32xf32>
    %26 = arith.truncf %25 : vector<8x32xf32> to vector<8x32xbf16>
    %27 = vector.extract_strided_slice %26 {offsets = [0, 0], sizes = [8, 8], strides = [1, 1]} : vector<8x32xbf16> to vector<8x8xbf16>
    %28 = vector.extract_strided_slice %26 {offsets = [0, 8], sizes = [8, 8], strides = [1, 1]} : vector<8x32xbf16> to vector<8x8xbf16>
    %29 = vector.extract_strided_slice %26 {offsets = [0, 16], sizes = [8, 8], strides = [1, 1]} : vector<8x32xbf16> to vector<8x8xbf16>
    %30 = vector.extract_strided_slice %26 {offsets = [0, 24], sizes = [8, 8], strides = [1, 1]} : vector<8x32xbf16> to vector<8x8xbf16>
    %31 = vector.shape_cast %27 : vector<8x8xbf16> to vector<1x8x8xbf16>
    %32 = vector.shape_cast %28 : vector<8x8xbf16> to vector<1x8x8xbf16>
    %33 = vector.shape_cast %29 : vector<8x8xbf16> to vector<1x8x8xbf16>
    %34 = vector.shape_cast %30 : vector<8x8xbf16> to vector<1x8x8xbf16>
    %35 = tpu.concatenate %31, %32, %33, %34 in 0 : vector<1x8x8xbf16>, vector<1x8x8xbf16>, vector<1x8x8xbf16>, vector<1x8x8xbf16> -> vector<4x8x8xbf16>
    %c0_18 = arith.constant 0 : index
    %c0_19 = arith.constant 0 : index
    %c0_20 = arith.constant 0 : index
    %36 = vector.load %arg24[%c0_18, %c0_19, %c0_20] : memref<4x8x8xbf16, #tpu.memory_space<vmem>>, vector<4x8x8xbf16>
    %c0_21 = arith.constant 0 : index
    %c0_22 = arith.constant 0 : index
    %c0_23 = arith.constant 0 : index
    %37 = vector.load %arg25[%c0_21, %c0_22, %c0_23] : memref<4x8x8xbf16, #tpu.memory_space<vmem>>, vector<4x8x8xbf16>
    "tpu.trace_start"() <{level = 10 : i32, message = "hqd,hkd->hqk"}> : () -> ()
    %cst_24 = arith.constant dense<0.000000e+00> : vector<4x8x8xf32>
    %38 = tpu.matmul %35, %36, %cst_24 {dimension_numbers = #tpu.dot_dimension_numbers<[2], [2], [1], [1], [0, 0, 0, 1, 1, 1], [0], [0]>} : vector<4x8x8xbf16>, vector<4x8x8xbf16>, vector<4x8x8xf32> -> vector<4x8x8xf32>
    %cst_25 = arith.constant -1.000000e+09 : f32
    "tpu.trace_stop"() : () -> ()
    %39 = vector.shape_cast %11 : vector<8x8xi1> to vector<1x8x8xi1>
    %40 = vector.broadcast %39 : vector<1x8x8xi1> to vector<4x8x8xi1>
    %41 = vector.broadcast %cst_25 : f32 to vector<4x8x8xf32>
    %42 = arith.select %40, %38, %41 : vector<4x8x8xi1>, vector<4x8x8xf32>
    %cst_26 = arith.constant dense<0xFF800000> : vector<4x8xf32>
    %43 = vector.multi_reduction <maximumf>, %42, %cst_26 [2] : vector<4x8x8xf32> to vector<4x8xf32>
    %44 = vector.shape_cast %43 : vector<4x8xf32> to vector<4x8x1xf32>
    %45 = vector.broadcast %44 : vector<4x8x1xf32> to vector<4x8x8xf32>
    %46 = arith.subf %42, %45 : vector<4x8x8xf32>
    %47 = math.exp %46 : vector<4x8x8xf32>
    %cst_27 = arith.constant dense<0.000000e+00> : vector<4x8xf32>
    %48 = vector.multi_reduction <add>, %47, %cst_27 [2] : vector<4x8x8xf32> to vector<4x8xf32>
    %49 = vector.shape_cast %48 : vector<4x8xf32> to vector<4x8x1xf32>
    %50 = tpu.reciprocal %49 {approx = true} : vector<4x8x1xf32> -> vector<4x8x1xf32>
    %51 = vector.broadcast %50 : vector<4x8x1xf32> to vector<4x8x8xf32>
    %52 = arith.mulf %47, %51 : vector<4x8x8xf32>
    %53 = arith.truncf %52 : vector<4x8x8xf32> to vector<4x8x8xbf16>
    %c0_28 = arith.constant 0 : index
    %c0_29 = arith.constant 0 : index
    %c0_30 = arith.constant 0 : index
    %c0_31 = arith.constant 0 : index
    %54 = vector.load %arg22[%c0_28, %c0_29, %c0_30, %c0_31] : memref<1x4x8x8xbf16, #tpu.memory_space<vmem>>, vector<1x4x8x8xbf16>
    %55 = vector.shape_cast %54 : vector<1x4x8x8xbf16> to vector<4x8x8xbf16>
    %56 = vector.shape_cast %53 : vector<4x8x8xbf16> to vector<1x4x8x8xbf16>
    tpu.vector_store %arg22[%c0_28, %c0_29, %c0_30, %c0_31], %56 {strides = array<i32>} : memref<1x4x8x8xbf16, #tpu.memory_space<vmem>>, vector<1x4x8x8xbf16>,
    %57 = arith.truncf %52 : vector<4x8x8xf32> to vector<4x8x8xbf16>
    "tpu.trace_start"() <{level = 10 : i32, message = "hqk,hkd->hqd"}> : () -> ()
    %cst_32 = arith.constant dense<0.000000e+00> : vector<4x8x8xf32>
    %58 = tpu.matmul %57, %37, %cst_32 {dimension_numbers = #tpu.dot_dimension_numbers<[2], [1], [1], [2], [0, 0, 0, 1, 1, 2], [0], [0]>} : vector<4x8x8xbf16>, vector<4x8x8xbf16>, vector<4x8x8xf32> -> vector<4x8x8xf32>
    "tpu.trace_stop"() : () -> ()
    %59 = vector.extract_strided_slice %58 {offsets = [0, 0, 0], sizes = [1, 8, 8], strides = [1, 1, 1]} : vector<4x8x8xf32> to vector<1x8x8xf32>
    %60 = vector.shape_cast %59 : vector<1x8x8xf32> to vector<8x8xf32>
    %61 = vector.extract_strided_slice %58 {offsets = [1, 0, 0], sizes = [1, 8, 8], strides = [1, 1, 1]} : vector<4x8x8xf32> to vector<1x8x8xf32>
    %62 = vector.shape_cast %61 : vector<1x8x8xf32> to vector<8x8xf32>
    %63 = vector.extract_strided_slice %58 {offsets = [2, 0, 0], sizes = [1, 8, 8], strides = [1, 1, 1]} : vector<4x8x8xf32> to vector<1x8x8xf32>
    %64 = vector.shape_cast %63 : vector<1x8x8xf32> to vector<8x8xf32>
    %65 = vector.extract_strided_slice %58 {offsets = [3, 0, 0], sizes = [1, 8, 8], strides = [1, 1, 1]} : vector<4x8x8xf32> to vector<1x8x8xf32>
    %66 = vector.shape_cast %65 : vector<1x8x8xf32> to vector<8x8xf32>
    %67 = tpu.concatenate %60, %62, %64, %66 in 1 : vector<8x8xf32>, vector<8x8xf32>, vector<8x8xf32>, vector<8x8xf32> -> vector<8x32xf32>
    %68 = arith.truncf %67 : vector<8x32xf32> to vector<8x32xbf16>
    %c1 = arith.constant 1 : index
    %c0_33 = arith.constant 0 : index
    %c0_34 = arith.constant 0 : index
    %69 = vector.load %arg6[%c1, %c0_33, %c0_34] : memref<2x32x32xbf16, #tpu.memory_space<vmem>>, vector<1x32x32xbf16>
    %70 = vector.shape_cast %69 : vector<1x32x32xbf16> to vector<32x32xbf16>
    %cst_35 = arith.constant dense<0.000000e+00> : vector<8x32xf32>
    %71 = tpu.matmul %68, %70, %cst_35 {dimension_numbers = #tpu.dot_dimension_numbers<[1], [0], [0], [1], [0, 0, 1, 1], [], []>} : vector<8x32xbf16>, vector<32x32xbf16>, vector<8x32xf32> -> vector<8x32xf32>
    %72 = vector.extract_strided_slice %16 {offsets = [1, 0], sizes = [1, 32], strides = [1, 1]} : vector<2x32xf32> to vector<1x32xf32>
    %73 = vector.broadcast %72 : vector<1x32xf32> to vector<8x32xf32>
    %74 = arith.addf %71, %73 : vector<8x32xf32>
    %75 = arith.addf %7, %74 : vector<8x32xf32>
    %c0_36 = arith.constant 0 : index
    %c0_37 = arith.constant 0 : index
    %76 = vector.load %arg10[%c0_36, %c0_37] : memref<2x32xf32, #tpu.memory_space<vmem>>, vector<2x32xf32>
    %77 = vector.extract_strided_slice %76 {offsets = [0, 0], sizes = [1, 32], strides = [1, 1]} : vector<2x32xf32> to vector<1x32xf32>
    %78 = vector.extract_strided_slice %76 {offsets = [1, 0], sizes = [1, 32], strides = [1, 1]} : vector<2x32xf32> to vector<1x32xf32>
    %cst_38 = arith.constant dense<0.000000e+00> : vector<8xf32>
    %79 = vector.multi_reduction <add>, %75, %cst_38 [1] : vector<8x32xf32> to vector<8xf32>
    %80 = vector.shape_cast %79 : vector<8xf32> to vector<8x1xf32>
    %cst_39 = arith.constant 3.200000e+01 : f32
    %81 = vector.broadcast %cst_39 : f32 to vector<8x1xf32>
    %82 = arith.divf %80, %81 : vector<8x1xf32>
    %83 = vector.broadcast %82 : vector<8x1xf32> to vector<8x32xf32>
    %84 = arith.subf %75, %83 : vector<8x32xf32>
    %85 = arith.mulf %84, %84 : vector<8x32xf32>
    %cst_40 = arith.constant dense<0.000000e+00> : vector<8xf32>
    %86 = vector.multi_reduction <add>, %85, %cst_40 [1] : vector<8x32xf32> to vector<8xf32>
    %87 = vector.shape_cast %86 : vector<8xf32> to vector<8x1xf32>
    %cst_41 = arith.constant 3.200000e+01 : f32
    %88 = vector.broadcast %cst_41 : f32 to vector<8x1xf32>
    %89 = arith.divf %87, %88 : vector<8x1xf32>
    %90 = vector.broadcast %82 : vector<8x1xf32> to vector<8x32xf32>
    %91 = arith.subf %75, %90 : vector<8x32xf32>
    %cst_42 = arith.constant 9.99999974E-6 : f32
    %92 = vector.broadcast %cst_42 : f32 to vector<8x1xf32>
    %93 = arith.addf %89, %92 : vector<8x1xf32>
    %94 = math.rsqrt %93 : vector<8x1xf32>
    %95 = vector.broadcast %94 : vector<8x1xf32> to vector<8x32xf32>
    %96 = arith.mulf %91, %95 : vector<8x32xf32>
    %97 = vector.broadcast %77 : vector<1x32xf32> to vector<8x32xf32>
    %98 = arith.mulf %96, %97 : vector<8x32xf32>
    %99 = vector.broadcast %78 : vector<1x32xf32> to vector<8x32xf32>
    %100 = arith.addf %98, %99 : vector<8x32xf32>
    %c0_43 = arith.constant 0 : index
    %c0_44 = arith.constant 0 : index
    %101 = vector.load %arg13[%c0_43, %c0_44] : memref<2x32xf32, #tpu.memory_space<vmem>>, vector<2x32xf32>
    %102 = arith.truncf %100 : vector<8x32xf32> to vector<8x32xbf16>
    %c0_45 = arith.constant 0 : index
    %c0_46 = arith.constant 0 : index
    %c0_47 = arith.constant 0 : index
    %103 = vector.load %arg11[%c0_45, %c0_46, %c0_47] : memref<2x32x32xbf16, #tpu.memory_space<vmem>>, vector<1x32x32xbf16>
    %104 = vector.shape_cast %103 : vector<1x32x32xbf16> to vector<32x32xbf16>
    %cst_48 = arith.constant dense<0.000000e+00> : vector<8x32xf32>
    %105 = tpu.matmul %102, %104, %cst_48 {dimension_numbers = #tpu.dot_dimension_numbers<[1], [0], [0], [1], [0, 0, 1, 1], [], []>} : vector<8x32xbf16>, vector<32x32xbf16>, vector<8x32xf32> -> vector<8x32xf32>
    %106 = vector.extract_strided_slice %101 {offsets = [0, 0], sizes = [1, 32], strides = [1, 1]} : vector<2x32xf32> to vector<1x32xf32>
    %107 = vector.broadcast %106 : vector<1x32xf32> to vector<8x32xf32>
    %108 = arith.addf %105, %107 : vector<8x32xf32>
    %cst_49 = arith.constant 0.353553385 : f32
    %109 = vector.broadcast %cst_49 : f32 to vector<8x32xf32>
    %110 = arith.mulf %108, %109 : vector<8x32xf32>
    %111 = arith.truncf %110 : vector<8x32xf32> to vector<8x32xbf16>
    %112 = vector.extract_strided_slice %111 {offsets = [0, 0], sizes = [8, 8], strides = [1, 1]} : vector<8x32xbf16> to vector<8x8xbf16>
    %113 = vector.extract_strided_slice %111 {offsets = [0, 8], sizes = [8, 8], strides = [1, 1]} : vector<8x32xbf16> to vector<8x8xbf16>
    %114 = vector.extract_strided_slice %111 {offsets = [0, 16], sizes = [8, 8], strides = [1, 1]} : vector<8x32xbf16> to vector<8x8xbf16>
    %115 = vector.extract_strided_slice %111 {offsets = [0, 24], sizes = [8, 8], strides = [1, 1]} : vector<8x32xbf16> to vector<8x8xbf16>
    %116 = vector.shape_cast %112 : vector<8x8xbf16> to vector<1x8x8xbf16>
    %117 = vector.shape_cast %113 : vector<8x8xbf16> to vector<1x8x8xbf16>
    %118 = vector.shape_cast %114 : vector<8x8xbf16> to vector<1x8x8xbf16>
    %119 = vector.shape_cast %115 : vector<8x8xbf16> to vector<1x8x8xbf16>
    %120 = tpu.concatenate %116, %117, %118, %119 in 0 : vector<1x8x8xbf16>, vector<1x8x8xbf16>, vector<1x8x8xbf16>, vector<1x8x8xbf16> -> vector<4x8x8xbf16>
    %c0_50 = arith.constant 0 : index
    %c0_51 = arith.constant 0 : index
    %c0_52 = arith.constant 0 : index
    %121 = vector.load %arg26[%c0_50, %c0_51, %c0_52] : memref<4x8x8xbf16, #tpu.memory_space<vmem>>, vector<4x8x8xbf16>
    %c0_53 = arith.constant 0 : index
    %c0_54 = arith.constant 0 : index
    %c0_55 = arith.constant 0 : index
    %122 = vector.load %arg27[%c0_53, %c0_54, %c0_55] : memref<4x8x8xbf16, #tpu.memory_space<vmem>>, vector<4x8x8xbf16>
    "tpu.trace_start"() <{level = 10 : i32, message = "hqd,hkd->hqk"}> : () -> ()
    %cst_56 = arith.constant dense<0.000000e+00> : vector<4x8x8xf32>
    %123 = tpu.matmul %120, %121, %cst_56 {dimension_numbers = #tpu.dot_dimension_numbers<[2], [2], [1], [1], [0, 0, 0, 1, 1, 1], [0], [0]>} : vector<4x8x8xbf16>, vector<4x8x8xbf16>, vector<4x8x8xf32> -> vector<4x8x8xf32>
    %cst_57 = arith.constant -1.000000e+09 : f32
    "tpu.trace_stop"() : () -> ()
    %124 = vector.shape_cast %15 : vector<8x8xi1> to vector<1x8x8xi1>
    %125 = vector.broadcast %124 : vector<1x8x8xi1> to vector<4x8x8xi1>
    %126 = vector.broadcast %cst_57 : f32 to vector<4x8x8xf32>
    %127 = arith.select %125, %123, %126 : vector<4x8x8xi1>, vector<4x8x8xf32>
    %cst_58 = arith.constant dense<0xFF800000> : vector<4x8xf32>
    %128 = vector.multi_reduction <maximumf>, %127, %cst_58 [2] : vector<4x8x8xf32> to vector<4x8xf32>
    %129 = vector.shape_cast %128 : vector<4x8xf32> to vector<4x8x1xf32>
    %130 = vector.broadcast %129 : vector<4x8x1xf32> to vector<4x8x8xf32>
    %131 = arith.subf %127, %130 : vector<4x8x8xf32>
    %132 = math.exp %131 : vector<4x8x8xf32>
    %cst_59 = arith.constant dense<0.000000e+00> : vector<4x8xf32>
    %133 = vector.multi_reduction <add>, %132, %cst_59 [2] : vector<4x8x8xf32> to vector<4x8xf32>
    %134 = vector.shape_cast %133 : vector<4x8xf32> to vector<4x8x1xf32>
    %135 = tpu.reciprocal %134 {approx = true} : vector<4x8x1xf32> -> vector<4x8x1xf32>
    %136 = vector.broadcast %135 : vector<4x8x1xf32> to vector<4x8x8xf32>
    %137 = arith.mulf %132, %136 : vector<4x8x8xf32>
    %138 = arith.truncf %137 : vector<4x8x8xf32> to vector<4x8x8xbf16>
    %c0_60 = arith.constant 0 : index
    %c0_61 = arith.constant 0 : index
    %c0_62 = arith.constant 0 : index
    %c0_63 = arith.constant 0 : index
    %139 = vector.load %arg23[%c0_60, %c0_61, %c0_62, %c0_63] : memref<1x4x8x8xbf16, #tpu.memory_space<vmem>>, vector<1x4x8x8xbf16>
    %140 = vector.shape_cast %139 : vector<1x4x8x8xbf16> to vector<4x8x8xbf16>
    %141 = vector.shape_cast %138 : vector<4x8x8xbf16> to vector<1x4x8x8xbf16>
    tpu.vector_store %arg23[%c0_60, %c0_61, %c0_62, %c0_63], %141 {strides = array<i32>} : memref<1x4x8x8xbf16, #tpu.memory_space<vmem>>, vector<1x4x8x8xbf16>,
    %142 = arith.truncf %137 : vector<4x8x8xf32> to vector<4x8x8xbf16>
    "tpu.trace_start"() <{level = 10 : i32, message = "hqk,hkd->hqd"}> : () -> ()
    %cst_64 = arith.constant dense<0.000000e+00> : vector<4x8x8xf32>
    %143 = tpu.matmul %142, %122, %cst_64 {dimension_numbers = #tpu.dot_dimension_numbers<[2], [1], [1], [2], [0, 0, 0, 1, 1, 2], [0], [0]>} : vector<4x8x8xbf16>, vector<4x8x8xbf16>, vector<4x8x8xf32> -> vector<4x8x8xf32>
    "tpu.trace_stop"() : () -> ()
    %144 = vector.extract_strided_slice %143 {offsets = [0, 0, 0], sizes = [1, 8, 8], strides = [1, 1, 1]} : vector<4x8x8xf32> to vector<1x8x8xf32>
    %145 = vector.shape_cast %144 : vector<1x8x8xf32> to vector<8x8xf32>
    %146 = vector.extract_strided_slice %143 {offsets = [1, 0, 0], sizes = [1, 8, 8], strides = [1, 1, 1]} : vector<4x8x8xf32> to vector<1x8x8xf32>
    %147 = vector.shape_cast %146 : vector<1x8x8xf32> to vector<8x8xf32>
    %148 = vector.extract_strided_slice %143 {offsets = [2, 0, 0], sizes = [1, 8, 8], strides = [1, 1, 1]} : vector<4x8x8xf32> to vector<1x8x8xf32>
    %149 = vector.shape_cast %148 : vector<1x8x8xf32> to vector<8x8xf32>
    %150 = vector.extract_strided_slice %143 {offsets = [3, 0, 0], sizes = [1, 8, 8], strides = [1, 1, 1]} : vector<4x8x8xf32> to vector<1x8x8xf32>
    %151 = vector.shape_cast %150 : vector<1x8x8xf32> to vector<8x8xf32>
    %152 = tpu.concatenate %145, %147, %149, %151 in 1 : vector<8x8xf32>, vector<8x8xf32>, vector<8x8xf32>, vector<8x8xf32> -> vector<8x32xf32>
    %153 = arith.truncf %152 : vector<8x32xf32> to vector<8x32xbf16>
    %c1_65 = arith.constant 1 : index
    %c0_66 = arith.constant 0 : index
    %c0_67 = arith.constant 0 : index
    %154 = vector.load %arg11[%c1_65, %c0_66, %c0_67] : memref<2x32x32xbf16, #tpu.memory_space<vmem>>, vector<1x32x32xbf16>
    %155 = vector.shape_cast %154 : vector<1x32x32xbf16> to vector<32x32xbf16>
    %cst_68 = arith.constant dense<0.000000e+00> : vector<8x32xf32>
    %156 = tpu.matmul %153, %155, %cst_68 {dimension_numbers = #tpu.dot_dimension_numbers<[1], [0], [0], [1], [0, 0, 1, 1], [], []>} : vector<8x32xbf16>, vector<32x32xbf16>, vector<8x32xf32> -> vector<8x32xf32>
    %157 = vector.extract_strided_slice %101 {offsets = [1, 0], sizes = [1, 32], strides = [1, 1]} : vector<2x32xf32> to vector<1x32xf32>
    %158 = vector.broadcast %157 : vector<1x32xf32> to vector<8x32xf32>
    %159 = arith.addf %156, %158 : vector<8x32xf32>
    %160 = arith.addf %100, %159 : vector<8x32xf32>
    %c0_69 = arith.constant 0 : index
    %c0_70 = arith.constant 0 : index
    %161 = vector.load %arg15[%c0_69, %c0_70] : memref<2x32xf32, #tpu.memory_space<vmem>>, vector<2x32xf32>
    %162 = vector.extract_strided_slice %161 {offsets = [0, 0], sizes = [1, 32], strides = [1, 1]} : vector<2x32xf32> to vector<1x32xf32>
    %163 = vector.extract_strided_slice %161 {offsets = [1, 0], sizes = [1, 32], strides = [1, 1]} : vector<2x32xf32> to vector<1x32xf32>
    %cst_71 = arith.constant dense<0.000000e+00> : vector<8xf32>
    %164 = vector.multi_reduction <add>, %160, %cst_71 [1] : vector<8x32xf32> to vector<8xf32>
    %165 = vector.shape_cast %164 : vector<8xf32> to vector<8x1xf32>
    %cst_72 = arith.constant 3.200000e+01 : f32
    %166 = vector.broadcast %cst_72 : f32 to vector<8x1xf32>
    %167 = arith.divf %165, %166 : vector<8x1xf32>
    %168 = vector.broadcast %167 : vector<8x1xf32> to vector<8x32xf32>
    %169 = arith.subf %160, %168 : vector<8x32xf32>
    %170 = arith.mulf %169, %169 : vector<8x32xf32>
    %cst_73 = arith.constant dense<0.000000e+00> : vector<8xf32>
    %171 = vector.multi_reduction <add>, %170, %cst_73 [1] : vector<8x32xf32> to vector<8xf32>
    %172 = vector.shape_cast %171 : vector<8xf32> to vector<8x1xf32>
    %cst_74 = arith.constant 3.200000e+01 : f32
    %173 = vector.broadcast %cst_74 : f32 to vector<8x1xf32>
    %174 = arith.divf %172, %173 : vector<8x1xf32>
    %175 = vector.broadcast %167 : vector<8x1xf32> to vector<8x32xf32>
    %176 = arith.subf %160, %175 : vector<8x32xf32>
    %cst_75 = arith.constant 9.99999974E-6 : f32
    %177 = vector.broadcast %cst_75 : f32 to vector<8x1xf32>
    %178 = arith.addf %174, %177 : vector<8x1xf32>
    %179 = math.rsqrt %178 : vector<8x1xf32>
    %180 = vector.broadcast %179 : vector<8x1xf32> to vector<8x32xf32>
    %181 = arith.mulf %176, %180 : vector<8x32xf32>
    %182 = vector.broadcast %162 : vector<1x32xf32> to vector<8x32xf32>
    %183 = arith.mulf %181, %182 : vector<8x32xf32>
    %184 = vector.broadcast %163 : vector<1x32xf32> to vector<8x32xf32>
    %185 = arith.addf %183, %184 : vector<8x32xf32>
    %186 = arith.truncf %185 : vector<8x32xf32> to vector<8x32xbf16>
    %c0_76 = arith.constant 0 : index
    %c0_77 = arith.constant 0 : index
    %187 = vector.load %arg16[%c0_76, %c0_77] : memref<32x64xbf16, #tpu.memory_space<vmem>>, vector<32x64xbf16>
    %cst_78 = arith.constant dense<0.000000e+00> : vector<8x64xf32>
    %188 = tpu.matmul %186, %187, %cst_78 {dimension_numbers = #tpu.dot_dimension_numbers<[1], [0], [0], [1], [0, 0, 1, 1], [], []>} : vector<8x32xbf16>, vector<32x64xbf16>, vector<8x64xf32> -> vector<8x64xf32>
    %c0_79 = arith.constant 0 : index
    %c0_80 = arith.constant 0 : index
    %189 = vector.load %arg17[%c0_79, %c0_80] : memref<1x64xf32, #tpu.memory_space<vmem>>, vector<1x64xf32>
    %190 = vector.broadcast %189 : vector<1x64xf32> to vector<8x64xf32>
    %191 = arith.addf %188, %190 : vector<8x64xf32>
    %cst_81 = arith.constant 0.000000e+00 : f32
    %192 = vector.broadcast %cst_81 : f32 to vector<8x64xf32>
    %193 = arith.maximumf %191, %192 : vector<8x64xf32>
    %194 = arith.truncf %193 : vector<8x64xf32> to vector<8x64xbf16>
    %c0_82 = arith.constant 0 : index
    %c0_83 = arith.constant 0 : index
    %195 = vector.load %arg18[%c0_82, %c0_83] : memref<64x32xbf16, #tpu.memory_space<vmem>>, vector<64x32xbf16>
    %cst_84 = arith.constant dense<0.000000e+00> : vector<8x32xf32>
    %196 = tpu.matmul %194, %195, %cst_84 {dimension_numbers = #tpu.dot_dimension_numbers<[1], [0], [0], [1], [0, 0, 1, 1], [], []>} : vector<8x64xbf16>, vector<64x32xbf16>, vector<8x32xf32> -> vector<8x32xf32>
    %c0_85 = arith.constant 0 : index
    %c0_86 = arith.constant 0 : index
    %197 = vector.load %arg19[%c0_85, %c0_86] : memref<1x32xf32, #tpu.memory_space<vmem>>, vector<1x32xf32>
    %198 = vector.broadcast %197 : vector<1x32xf32> to vector<8x32xf32>
    %199 = arith.addf %196, %198 : vector<8x32xf32>
    %200 = arith.addf %185, %199 : vector<8x32xf32>
    %c0_87 = arith.constant 0 : index
    %c0_88 = arith.constant 0 : index
    %201 = vector.load %arg20[%c0_87, %c0_88] : memref<2x32xf32, #tpu.memory_space<vmem>>, vector<2x32xf32>
    %202 = vector.extract_strided_slice %201 {offsets = [0, 0], sizes = [1, 32], strides = [1, 1]} : vector<2x32xf32> to vector<1x32xf32>
    %203 = vector.extract_strided_slice %201 {offsets = [1, 0], sizes = [1, 32], strides = [1, 1]} : vector<2x32xf32> to vector<1x32xf32>
    %cst_89 = arith.constant dense<0.000000e+00> : vector<8xf32>
    %204 = vector.multi_reduction <add>, %200, %cst_89 [1] : vector<8x32xf32> to vector<8xf32>
    %205 = vector.shape_cast %204 : vector<8xf32> to vector<8x1xf32>
    %cst_90 = arith.constant 3.200000e+01 : f32
    %206 = vector.broadcast %cst_90 : f32 to vector<8x1xf32>
    %207 = arith.divf %205, %206 : vector<8x1xf32>
    %208 = vector.broadcast %207 : vector<8x1xf32> to vector<8x32xf32>
    %209 = arith.subf %200, %208 : vector<8x32xf32>
    %210 = arith.mulf %209, %209 : vector<8x32xf32>
    %cst_91 = arith.constant dense<0.000000e+00> : vector<8xf32>
    %211 = vector.multi_reduction <add>, %210, %cst_91 [1] : vector<8x32xf32> to vector<8xf32>
    %212 = vector.shape_cast %211 : vector<8xf32> to vector<8x1xf32>
    %cst_92 = arith.constant 3.200000e+01 : f32
    %213 = vector.broadcast %cst_92 : f32 to vector<8x1xf32>
    %214 = arith.divf %212, %213 : vector<8x1xf32>
    %215 = vector.broadcast %207 : vector<8x1xf32> to vector<8x32xf32>
    %216 = arith.subf %200, %215 : vector<8x32xf32>
    %cst_93 = arith.constant 9.99999974E-6 : f32
    %217 = vector.broadcast %cst_93 : f32 to vector<8x1xf32>
    %218 = arith.addf %214, %217 : vector<8x1xf32>
    %219 = math.rsqrt %218 : vector<8x1xf32>
    %220 = vector.broadcast %219 : vector<8x1xf32> to vector<8x32xf32>
    %221 = arith.mulf %216, %220 : vector<8x32xf32>
    %222 = vector.broadcast %202 : vector<1x32xf32> to vector<8x32xf32>
    %223 = arith.mulf %221, %222 : vector<8x32xf32>
    %224 = vector.broadcast %203 : vector<1x32xf32> to vector<8x32xf32>
    %225 = arith.addf %223, %224 : vector<8x32xf32>
    %c0_94 = arith.constant 0 : index
    %c0_95 = arith.constant 0 : index
    %c0_96 = arith.constant 0 : index
    %226 = vector.load %arg21[%c0_94, %c0_95, %c0_96] : memref<1x8x32xf32, #tpu.memory_space<vmem>>, vector<1x8x32xf32>
    %227 = vector.shape_cast %226 : vector<1x8x32xf32> to vector<8x32xf32>
    %228 = vector.shape_cast %225 : vector<8x32xf32> to vector<1x8x32xf32>
    tpu.vector_store %arg21[%c0_94, %c0_95, %c0_96], %228 {strides = array<i32>} : memref<1x8x32xf32, #tpu.memory_space<vmem>>, vector<1x8x32xf32>,
    return
  }
  func.func @transform_0(%arg0: i32, %arg1: i32) -> (i32, i32, i32) {
    %c0_i32 = arith.constant 0 : i32
    %c0_i32_0 = arith.constant 0 : i32
    %c0_i32_1 = arith.constant 0 : i32
    return %arg0, %c0_i32, %c0_i32_0 : i32, i32, i32
  }
  func.func @transform_1(%arg0: i32, %arg1: i32) -> (i32, i32, i32) {
    %c0_i32 = arith.constant 0 : i32
    %c0_i32_0 = arith.constant 0 : i32
    %c0_i32_1 = arith.constant 0 : i32
    return %arg0, %c0_i32, %c0_i32_0 : i32, i32, i32
  }
  func.func @transform_2(%arg0: i32, %arg1: i32) -> (i32, i32, i32, i32) {
    %c0_i32 = arith.constant 0 : i32
    %c0_i32_0 = arith.constant 0 : i32
    %c0_i32_1 = arith.constant 0 : i32
    return %arg0, %c0_i32, %arg1, %c0_i32_0 : i32, i32, i32, i32
  }
  func.func @transform_3(%arg0: i32, %arg1: i32) -> (i32, i32, i32, i32) {
    %c0_i32 = arith.constant 0 : i32
    %c0_i32_0 = arith.constant 0 : i32
    %c0_i32_1 = arith.constant 0 : i32
    return %arg0, %c0_i32, %arg1, %c0_i32_0 : i32, i32, i32, i32
  }
  func.func @transform_4(%arg0: i32, %arg1: i32) -> (i32, i32, i32) {
    %c0_i32 = arith.constant 0 : i32
    %c0_i32_0 = arith.constant 0 : i32
    %c0_i32_1 = arith.constant 0 : i32
    %c0_i32_2 = arith.constant 0 : i32
    return %c0_i32, %c0_i32_0, %c0_i32_1 : i32, i32, i32
  }
  func.func @transform_5(%arg0: i32, %arg1: i32) -> (i32, i32) {
    %c0_i32 = arith.constant 0 : i32
    %c0_i32_0 = arith.constant 0 : i32
    %c0_i32_1 = arith.constant 0 : i32
    return %c0_i32, %c0_i32_0 : i32, i32
  }
  func.func @transform_6(%arg0: i32, %arg1: i32) -> (i32, i32) {
    %c0_i32 = arith.constant 0 : i32
    %c0_i32_0 = arith.constant 0 : i32
    %c0_i32_1 = arith.constant 0 : i32
    return %c0_i32, %c0_i32_0 : i32, i32
  }
  func.func @transform_7(%arg0: i32, %arg1: i32) -> (i32, i32) {
    %c0_i32 = arith.constant 0 : i32
    %c0_i32_0 = arith.constant 0 : i32
    %c0_i32_1 = arith.constant 0 : i32
    return %c0_i32, %c0_i32_0 : i32, i32
  }
  func.func @transform_8(%arg0: i32, %arg1: i32) -> (i32, i32) {
    %c0_i32 = arith.constant 0 : i32
    %c0_i32_0 = arith.constant 0 : i32
    %c0_i32_1 = arith.constant 0 : i32
    return %c0_i32, %c0_i32_0 : i32, i32
  }
  func.func @transform_9(%arg0: i32, %arg1: i32) -> (i32, i32, i32) {
    %c0_i32 = arith.constant 0 : i32
    %c0_i32_0 = arith.constant 0 : i32
    %c0_i32_1 = arith.constant 0 : i32
    %c0_i32_2 = arith.constant 0 : i32
    return %c0_i32, %c0_i32_0, %c0_i32_1 : i32, i32, i32
  }
  func.func @transform_10(%arg0: i32, %arg1: i32) -> (i32, i32) {
    %c0_i32 = arith.constant 0 : i32
    %c0_i32_0 = arith.constant 0 : i32
    %c0_i32_1 = arith.constant 0 : i32
    return %c0_i32, %c0_i32_0 : i32, i32
  }
  func.func @transform_11(%arg0: i32, %arg1: i32) -> (i32, i32) {
    %c0_i32 = arith.constant 0 : i32
    %c0_i32_0 = arith.constant 0 : i32
    %c0_i32_1 = arith.constant 0 : i32
    return %c0_i32, %c0_i32_0 : i32, i32
  }
  func.func @transform_12(%arg0: i32, %arg1: i32) -> (i32, i32) {
    %c0_i32 = arith.constant 0 : i32
    %c0_i32_0 = arith.constant 0 : i32
    %c0_i32_1 = arith.constant 0 : i32
    return %c0_i32, %c0_i32_0 : i32, i32
  }
  func.func @transform_13(%arg0: i32, %arg1: i32) -> (i32, i32) {
    %c0_i32 = arith.constant 0 : i32
    %c0_i32_0 = arith.constant 0 : i32
    %c0_i32_1 = arith.constant 0 : i32
    return %c0_i32, %c0_i32_0 : i32, i32
  }
  func.func @transform_14(%arg0: i32, %arg1: i32) -> (i32, i32) {
    %c0_i32 = arith.constant 0 : i32
    %c0_i32_0 = arith.constant 0 : i32
    %c0_i32_1 = arith.constant 0 : i32
    return %c0_i32, %c0_i32_0 : i32, i32
  }
  func.func @transform_15(%arg0: i32, %arg1: i32) -> (i32, i32) {
    %c0_i32 = arith.constant 0 : i32
    %c0_i32_0 = arith.constant 0 : i32
    %c0_i32_1 = arith.constant 0 : i32
    return %c0_i32, %c0_i32_0 : i32, i32
  }
  func.func @transform_16(%arg0: i32, %arg1: i32) -> (i32, i32) {
    %c0_i32 = arith.constant 0 : i32
    %c0_i32_0 = arith.constant 0 : i32
    %c0_i32_1 = arith.constant 0 : i32
    return %c0_i32, %c0_i32_0 : i32, i32
  }
  func.func @transform_17(%arg0: i32, %arg1: i32) -> (i32, i32) {
    %c0_i32 = arith.constant 0 : i32
    %c0_i32_0 = arith.constant 0 : i32
    %c0_i32_1 = arith.constant 0 : i32
    return %c0_i32, %c0_i32_0 : i32, i32
  }
  func.func @transform_18(%arg0: i32, %arg1: i32) -> (i32, i32) {
    %c0_i32 = arith.constant 0 : i32
    %c0_i32_0 = arith.constant 0 : i32
    %c0_i32_1 = arith.constant 0 : i32
    return %c0_i32, %c0_i32_0 : i32, i32
  }
  func.func @transform_19(%arg0: i32, %arg1: i32) -> (i32, i32, i32) {
    %c0_i32 = arith.constant 0 : i32
    %c0_i32_0 = arith.constant 0 : i32
    return %arg0, %arg1, %c0_i32 : i32, i32, i32
  }
  func.func @transform_20(%arg0: i32, %arg1: i32) -> (i32, i32, i32, i32) {
    %c0_i32 = arith.constant 0 : i32
    %c0_i32_0 = arith.constant 0 : i32
    %c0_i32_1 = arith.constant 0 : i32
    return %arg0, %c0_i32, %arg1, %c0_i32_0 : i32, i32, i32, i32
  }
  func.func @transform_21(%arg0: i32, %arg1: i32) -> (i32, i32, i32, i32) {
    %c0_i32 = arith.constant 0 : i32
    %c0_i32_0 = arith.constant 0 : i32
    %c0_i32_1 = arith.constant 0 : i32
    return %arg0, %c0_i32, %arg1, %c0_i32_0 : i32, i32, i32, i32
  }
}

</mosaic_0001>

<bundles_post_ra>
// kernel: tpu_custom_call.1
= control target key start
LH: loop header
LB: loop body
LE: loop exit
PB: predicated region body
PF: predicated region fallthrough
CT: control target
= control target key end

     0   :  { %s5007_s0 = inlined_call_operand.hbm [shape: f32[2,8,32], index: 0, kind: input, shape index: {}]   ;;  %s5008_s1 = inlined_call_operand.hbm [shape: bf16[2,8,32], index: 1, kind: input, shape index: {}]   ;;  %s5009_s2 = inlined_call_operand.hbm [shape: bf16[2,1,8,8], index: 2, kind: input, shape index: {}]   ;;  %s5010_s3 = inlined_call_operand.hbm [shape: bf16[2,1,8,8], index: 3, kind: input, shape index: {}]   ;;  %s5011_s4 = inlined_call_operand.vmem [shape: bf16[2,32,32], index: 4, kind: input, shape index: {}]   ;;  %s5012_s5 = inlined_call_operand.hbm [shape: bf16[32,64], index: 5, kind: input, shape index: {}]   ;;  %s5013_s6 = inlined_call_operand.hbm [shape: f32[2,32], index: 6, kind: input, shape index: {}]   ;;  %s5014_s7 = inlined_call_operand.vmem [shape: f32[1,64], index: 7, kind: input, shape index: {}]   ;;  %s5015_s8 = inlined_call_operand.hbm [shape: f32[2,32], index: 8, kind: input, shape index: {}]   ;;  %s5016_s9 = inlined_call_operand.vmem [shape: bf16[2,32,32], index: 9, kind: input, shape index: {}]   ;;  %s5017_s10 = inlined_call_operand.hbm [shape: bf16[32,64], index: 10, kind: input, shape index: {}]   ;;  %s5018_s11 = inlined_call_operand.hbm [shape: f32[2,32], index: 11, kind: input, shape index: {}]   ;;  %s5019_s12 = inlined_call_operand.hbm [shape: f32[1,64], index: 12, kind: input, shape index: {}]   ;;  %s5020_s13 = inlined_call_operand.hbm [shape: f32[2,32], index: 13, kind: input, shape index: {}]   ;;  %s5021_s14 = inlined_call_operand.vmem [shape: bf16[32,64], index: 14, kind: input, shape index: {}]   ;;  %s5022_s15 = inlined_call_operand.vmem [shape: f32[1,64], index: 15, kind: input, shape index: {}]   ;;  %s5023_s16 = inlined_call_operand.vmem [shape: bf16[64,32], index: 16, kind: input, shape index: {}]   ;;  %s5024_s17 = inlined_call_operand.vmem [shape: f32[1,32], index: 17, kind: input, shape index: {}]   ;;  %s5025_s18 = inlined_call_operand.vmem [shape: f32[2,32], index: 18, kind: input, shape index: {}]   ;;  %s5026_s19 = inlined_call_operand.hbm [shape: f32[2,8,32], index: 19, kind: output, shape index: {0}]   ;;  %s5027_s20 = inlined_call_operand.hbm [shape: bf16[2,4,8,8], index: 20, kind: output, shape index: {1}]   ;;  %s5028_s21 = inlined_call_operand.hbm [shape: bf16[2,4,8,8], index: 21, kind: output, shape index: {2}]  }
   0x1   :  { %5066 = sst [smem:[#allocation43_spill]] %s5007_s0 }
   0x2   :  { %5067 = sst [smem:[#allocation44_spill]] %s5008_s1 }
   0x3   :  { %5068 = sst [smem:[#allocation45_spill]] %s5009_s2 }
   0x4   :  { %5069 = sst [smem:[#allocation46_spill]] %s5010_s3 }
   0x5   :  { %5070 = sst [smem:[#allocation47_spill]] %s5011_s4 }
   0x6   :  { %5071 = sst [smem:[#allocation48_spill]] %s5012_s5 }
   0x7   :  { %5072 = sst [smem:[#allocation49_spill]] %s5013_s6 }
   0x8   :  { %5073 = sst [smem:[#allocation50_spill]] %s5014_s7 }
   0x9   :  { %5074 = sst [smem:[#allocation51_spill]] %s5016_s9 }
   0xa   :  { %5075 = sst [smem:[#allocation52_spill]] %s5017_s10 }
   0xb   :  { %5076 = sst [smem:[#allocation53_spill]] %s5019_s12 }
   0xc   :  { %5077 = sst [smem:[#allocation54_spill]] %s5021_s14 }
   0xd   :  { %5078 = sst [smem:[#allocation55_spill]] %s5022_s15 }
   0xe   :  { %5079 = sst [smem:[#allocation56_spill]] %s5023_s16 }
   0xf   :  { %5080 = sst [smem:[#allocation57_spill]] %s5024_s17 }
  0x10   :  { %5081 = sst [smem:[#allocation58_spill]] %s5025_s18 }
  0x11   :  { %5082 = sst [smem:[#allocation59_spill]] %s5026_s19 }
  0x12   :  { %5083 = sst [smem:[#allocation60_spill]] %s5027_s20 }
  0x13   :  { %5084 = sst [smem:[#allocation61_spill]] %s5028_s21 }
  0x14   :  { %27 = vsyncpa [#allocation7], 0 }
  0x15   :  { %29 = vsyncpa [#allocation7 + $0x1], 0 }
  0x16   :  { %30 = vsyncpa [#allocation10], 0 }
  0x17   :  { %32 = vsyncpa [#allocation10 + $0x1], 0 }
  0x18   :  { %33 = vsyncpa [#allocation13], 0 }
  0x19   :  { %35 = vsyncpa [#allocation13 + $0x1], 0 }
  0x1a   :  { %36 = vsyncpa [#allocation16], 0 }
  0x1b   :  { %37 = vsyncpa [#allocation19], 0 }
  0x1c   :  { %38 = vsyncpa [#allocation22], 0 }
  0x1d   :  { %39 = vsyncpa [#allocation8], 0 }
  0x1e   :  { %41 = vsyncpa [#allocation8 + $0x1], 0 }
  0x1f   :  { %42 = vsyncpa [#allocation26], 0 }
  0x20   :  { %44 = vsyncpa [#allocation26 + $0x1], 0  ;;  %s4080_s2 = smov 0   ;;  %s4082_s25 = smov 0  }
  0x21   :  { %s4084_s26 = smov 0   ;;  %s4086_s27 = smov 0  }
  0x22   :  { %s4088_s3 = smov 0   ;;  %s4090_s28 = smov 0  }
  0x23 LB: > { %5085 = sst [smem:[#allocation37_spill]] %s3917_s2  ;;  %s4111_s29 = sadd.s32 4294967295, %s3937_s28   ;;  %s3937_s28 = sphi %s4090_s28, %s50_s28   ;;  %s3933_s3 = sphi %s4088_s3, %s5161_s3   ;;  %s3929_s27 = sphi %s4086_s27, %s5160_s27   ;;  %s3925_s26 = sphi %s4084_s26, %s5156_s26   ;;  %s3921_s25 = sphi %s4082_s25, %s5159_s25   ;;  %s3917_s2 = sphi %s4080_s2, %s5158_s2  }
  0x24   : > { %5086 = sst [smem:[#allocation38_spill]] %s3925_s26  ;;  %p2900_p0 = scmp.ge.s32.totalorder %s3937_s28, 1 }
  0x25   : > { %5087 = sst [smem:[#allocation39_spill]] %s3929_s27  ;;  %p5042_p1 = scmp.eq.s32.totalorder %s4111_s29, 0 }
  0x26   : > { %p574_p2 = scmp.lt.s32.totalorder %s3937_s28, 3  ;;  %s3939_s4 = smov [#allocation14]  }
  0x27   : > { %s589_s30 = sshll.u32 %s3939_s4, 4  ;;  %s3940_s22 = smov [#allocation15]   ;;  %s4120_s30 = int_to_ptr.vmem [resolvable:$true] %s589_s30 }
  0x28   : > { %p4116_p3 = pnand %p2900_p0, %p574_p2  ;;  %s603_s23 = sshll.u32 %s3940_s22, 4  ;;  %s4131_s23 = int_to_ptr.vmem [resolvable:$true] %s603_s23 }
  0x29   : > { %s3941_s1 = smov [#allocation18]   ;;  %s5090_s18 = sld [smem:[#allocation48_spill]] }
  0x2a   : > { %s5088_s0 = scalar_select %p4116_p3, 1, 0 }
  0x2b   : > { %p3266_p4 = pneg %p4116_p3  ;;  %s4133_s24 = sshll.u32 %s3941_s1, 4  ;;  %s631_s24 = int_to_ptr.vmem [resolvable:$true] %s4133_s24 }
  0x2d   : > { %p4127_p6 = pnand %p3266_p4, %p5042_p1 }
  0x2f   : > { %s5089_s5 = scalar_select %p4127_p6, 1, 0 }
  0x30   : > { %s3455_s21 = scalar_lea.hbm %s5090_s18, 256  ;;  %p4143_p8 = pneg %p4127_p6 }
  0x31   : > { %p3456_p7 = scmp.ne.s32.totalorder %s5090_s18, %s3455_s21  ;;  %p3462_p11 = scmp.lt.u32.totalorder %s3455_s21, %s5090_s18 }
  0x32   : > { %s5091_s17 = scalar_select %p4143_p8, 1, 0 }
  0x33   : > { %p3458_p9 = pnand %p4143_p8, %p3456_p7 }
  0x35   : > { %p3459_p10 = pneg %p3458_p9 }
  0x37   : > { %p3464_p12 = pnand %p3462_p11, %p3459_p10 }
  0x39   : > { %3467 = shalt.err (!%p3464_p12)
}
  0x3a   : > { %s3468_s19 = scalar_lea.vmem %s4120_s30, 256  ;;  %p3476_p4 = scmp.lt.s32.totalorder %s4120_s30, %s4120_s30 }
  0x3b   : > { %p3469_p13 = scmp.ne.s32.totalorder %s4120_s30, %s3468_s19  ;;  %p3477_p5 = scmp.lt.s32.totalorder %s3468_s19, %s3468_s19 }
  0x3d   : > { %p3471_p0 = pnand %p3469_p13, %p4143_p8  ;;  %p3478_p7 = por %p3477_p5, %p3476_p4 }
  0x3f   : > { %p3472_p2 = pneg %p3471_p0 }
  0x41   : > { %p3479_p9 = pnand %p3478_p7, %p3472_p2 }
  0x43   : > { %3482 = shalt.err (!%p3479_p9)
}
  0x44   : > { %s3942_s20 = smov 64   ;;  %s3943_s21 = smov 4  }
  0x45   : > { %3269 = dma.hbm_to_vmem [thread:$0]  (!%p4127_p6), %s5090_s18, 256, %s4120_s30, [#allocation13], %s3942_s20, %s3942_s20, %s3943_s21  }
  0x46   : > { %s5092_s6 = sld [smem:[#allocation49_spill]] }
  0x4c   : > { %s3483_s19 = scalar_lea.hbm %s5092_s6, 32 }
  0x4d   : > { %p3484_p5 = scmp.ne.s32.totalorder %s5092_s6, %s3483_s19  ;;  %p3490_p12 = scmp.lt.u32.totalorder %s3483_s19, %s5092_s6 }
  0x4f   : > { %p3486_p10 = pnand %p3484_p5, %p4143_p8 }
  0x51   : > { %p3487_p11 = pneg %p3486_p10 }
  0x53   : > { %p3492_p13 = pnand %p3490_p12, %p3487_p11 }
  0x55   : > { %3495 = shalt.err (!%p3492_p13)
}
  0x56   : > { %s3496_s30 = scalar_lea.vmem %s4131_s23, 32  ;;  %p3504_p7 = scmp.lt.s32.totalorder %s4131_s23, %s4131_s23 }
  0x57   : > { %p3497_p0 = scmp.ne.s32.totalorder %s4131_s23, %s3496_s30  ;;  %p3505_p9 = scmp.lt.s32.totalorder %s3496_s30, %s3496_s30 }
  0x59   : > { %p3499_p2 = pnand %p3497_p0, %p4143_p8  ;;  %p3506_p5 = por %p3505_p9, %p3504_p7 }
  0x5b   : > { %p3500_p4 = pneg %p3499_p2 }
  0x5d   : > { %p3507_p10 = pnand %p3506_p5, %p3500_p4 }
  0x5f   : > { %3510 = shalt.err (!%p3507_p10)
}
  0x60   : > { %3272 = dma.hbm_to_vmem [thread:$0]  (!%p4127_p6), %s5092_s6, 32, %s4131_s23, [#allocation16]  }
  0x61   : > { %s5093_s10 = sld [smem:[#allocation52_spill]] }
  0x67   : > { %s3511_s27 = scalar_lea.hbm %s5093_s10, 256 }
  0x68   : > { %p3512_p11 = scmp.ne.s32.totalorder %s5093_s10, %s3511_s27  ;;  %p3518_p0 = scmp.lt.u32.totalorder %s3511_s27, %s5093_s10 }
  0x6a   : > { %p3514_p12 = pnand %p3512_p11, %p4143_p8 }
  0x6c   : > { %p3515_p13 = pneg %p3514_p12 }
  0x6e   : > { %p3520_p2 = pnand %p3518_p0, %p3515_p13 }
  0x70   : > { %3523 = shalt.err (!%p3520_p2)
}
  0x71   : > { %s3524_s30 = scalar_lea.vmem %s631_s24, 256  ;;  %p3532_p5 = scmp.lt.s32.totalorder %s631_s24, %s631_s24 }
  0x72   : > { %p3525_p4 = scmp.ne.s32.totalorder %s631_s24, %s3524_s30  ;;  %p3533_p10 = scmp.lt.s32.totalorder %s3524_s30, %s3524_s30 }
  0x74   : > { %p3527_p7 = pnand %p3525_p4, %p4143_p8  ;;  %p3534_p1 = por %p3533_p10, %p3532_p5 }
  0x76   : > { %p3528_p9 = pneg %p3527_p7 }
  0x78   : > { %p3535_p3 = pnand %p3534_p1, %p3528_p9 }
  0x7a   : > { %3538 = shalt.err (!%p3535_p3)
}
  0x7b   : > { %3278 = dma.hbm_to_vmem [thread:$0]  (!%p4127_p6), %s5093_s10, 256, %s631_s24, [#allocation19], %s3942_s20, %s3942_s20, %s3943_s21  }
  0x7c   : > { %s3944_s14 = smov [#allocation21]   ;;  %s5094_s12 = sld [smem:[#allocation53_spill]] }
  0x7d   : > { %s655_s15 = sshll.u32 %s3944_s14, 4  ;;  %s656_s15 = int_to_ptr.vmem [resolvable:$true] %s655_s15 }
  0x82   : > { %s3539_s4 = scalar_lea.hbm %s5094_s12, 16 }
  0x83   : > { %p3540_p1 = scmp.ne.s32.totalorder %s5094_s12, %s3539_s4  ;;  %p3546_p12 = scmp.lt.u32.totalorder %s3539_s4, %s5094_s12 }
  0x85   : > { %p3542_p3 = pnand %p3540_p1, %p4143_p8 }
  0x87   : > { %p3543_p11 = pneg %p3542_p3 }
  0x89   : > { %p3548_p13 = pnand %p3546_p12, %p3543_p11 }
  0x8b   : > { %3551 = shalt.err (!%p3548_p13)
}
  0x8c   : > { %s3552_s24 = scalar_lea.vmem %s656_s15, 16  ;;  %s3559_s20 = scalar_lea.vmem %s656_s15, 32 }
  0x8d   : > { %p3553_p0 = scmp.ne.s32.totalorder %s656_s15, %s3552_s24  ;;  %p3560_p7 = scmp.lt.s32.totalorder %s656_s15, %s656_s15 }
  0x8e   : > { %p3561_p9 = scmp.lt.s32.totalorder %s3559_s20, %s3552_s24 }
  0x8f   : > { %p3555_p2 = pnand %p3553_p0, %p4143_p8 }
  0x90   : > { %p3562_p5 = por %p3561_p9, %p3560_p7 }
  0x91   : > { %p3556_p4 = pneg %p3555_p2 }
  0x93   : > { %p3563_p10 = pnand %p3562_p5, %p3556_p4 }
  0x95   : > { %3566 = shalt.err (!%p3563_p10)
}
  0x96   : > { %3284 = dma.hbm_to_vmem [thread:$0]  (!%p4127_p6), %s5094_s12, 16, %s656_s15, [#allocation22]  }
  0x97   : > { %s5044_s9 = sadd.s32 4294967294, %s3937_s28   ;;  %s62_s14 = sadd.s32 1, %s3933_s3 }
  0x98   : > { %p64_p1 = scmp.ge.s32.totalorder %s62_s14, 2  ;;  %s69_s16 = sadd.s32 1, %s3925_s26 }
  0x99   : > { %p76_p3 = scmp.ne.s32.totalorder %s3925_s26, %s3921_s25  ;;  %p77_p11 = scmp.eq.s32.totalorder %s3937_s28, 0 }
  0x9a   : > { %s5163_s14 = smov (%p64_p1, %s62_s14), 0  ;;  %p82_p13 = scmp.ne.s32.totalorder %s3921_s25, %s3917_s2 }
  0x9b   : > { %5095 = sst [smem:[#allocation40_spill]] %s5163_s14  ;;  %p4238_p12 = por %p77_p11, %p76_p3 }
  0x9c   : > { %s66_s15 = ssub.s32 %s3933_s3, %s5163_s14  ;;  %p505_p0 = scmp.eq.s32.totalorder %s4111_s29, 1 }
  0x9d   : > { %p67_p2 = scmp.eq.s32.totalorder %s66_s15, 0  ;;  %p5097_p4 = scmp.eq.s32.totalorder %s4111_s29, 0 }
  0x9e   : > { %p4253_p9 = por %p505_p0, %p76_p3  ;;  %p511_p5 = scmp.eq.s32.totalorder %s5044_s9, 1 }
  0x9f   : > { %p4249_p7 = por %p5097_p4, %p82_p13  ;;  %p3318_p1 = scmp.lt.s32.totalorder %s3937_s28, 2 }
  0xa0   : > { %s5099_s22 = scalar_select %p4253_p9, 1, 0 }
  0xa1   : > { %s5098_s4 = scalar_select %p4249_p7, 1, 0 }
  0xa2   : > { %s4260_s1 = scalar_select %p67_p2, %s3925_s26, %s69_s16  }
  0xa3   : > { %p4262_p10 = por %p511_p5, %p82_p13  ;;  %s4268_s30 = sand.u32 1, %s3925_s26  }
  0xa4   : > { %5100 = sst [smem:[#allocation41_spill]] %s4260_s1  ;;  %p4273_p11 = pnand %p3318_p1, %p4238_p12 }
  0xa5   : > { %s5101_s19 = scalar_select %p4262_p10, 1, 0 }
  0xa6   : > { %s5103_s20 = scalar_select %p4273_p11, 1, 0 }
  0xa7   : > { %5102 = sst [smem:[#allocation42_spill]] %s5101_s19  ;;  %s4278_s21 = sshll.u32 %s4268_s30, 2 }
  0xa8   : > { %s4281_s23 = sshll.u32 %s3933_s3, 6  ;;  %s5104_s9 = sld [smem:[#allocation44_spill]] }
  0xa9   : > { %s714_s27 = scalar_lea.vmem [#allocation9], %s4278_s21  ;;  %s5105_s10 = sand.u32 1, %s3937_s28  }
  0xaa   : > { %s721_s24 = sshll.u32 %s714_s27, 4  ;;  %s4294_s12 = scalar_lea.sflag [#allocation10], %s5105_s10  ;;  %s4290_s24 = int_to_ptr.vmem [resolvable:$true] %s721_s24 }
  0xab   : > { %p4300_p12 = pneg %p4273_p11 }
  0xad   : > { %s5106_s14 = scalar_select %p4300_p12, 1, 0 }
  0xae   : > { %s4287_s6 = scalar_lea.hbm %s5104_s9, %s4281_s23  ;;  %s3572_s27 = scalar_lea.hbm %s5104_s9, 128 }
  0xaf   : > { %s3567_s18 = scalar_lea.hbm %s4287_s6, 64  ;;  %p3573_p2 = scmp.lt.u32.totalorder %s4287_s6, %s5104_s9 }
  0xb0   : > { %p3568_p3 = scmp.ne.s32.totalorder %s4287_s6, %s3567_s18  ;;  %p3574_p4 = scmp.lt.u32.totalorder %s3572_s27, %s3567_s18 }
  0xb1   : > { %p3576_p1 = scmp.lt.u32.totalorder %s3567_s18, %s4287_s6 }
  0xb2   : > { %p3570_p13 = pnand %p4300_p12, %p3568_p3  ;;  %p3575_p5 = por %p3574_p4, %p3573_p2 }
  0xb4   : > { %p3571_p0 = pneg %p3570_p13  ;;  %p3577_p10 = por %p3576_p1, %p3575_p5 }
  0xb6   : > { %p3578_p9 = pnand %p3577_p10, %p3571_p0 }
  0xb8   : > { %3581 = shalt.err (!%p3578_p9)
}
  0xb9   : > { %s3582_s10 = scalar_lea.vmem %s4290_s24, 64  ;;  %s3945_s16 = smov [#allocation9]  }
  0xba   : > { %p3583_p3 = scmp.ne.s32.totalorder %s4290_s24, %s3582_s10  ;;  %s3587_s15 = sshll.u32 %s3945_s16, 4  ;;  %s3588_s15 = int_to_ptr.vmem [resolvable:$false] %s3587_s15 }
  0xbb   : > { %s3589_s26 = scalar_lea.vmem %s3588_s15, 128  ;;  %p3590_p6 = scmp.lt.s32.totalorder %s4290_s24, %s3588_s15 }
  0xbc   : > { %p3585_p13 = pnand %p3583_p3, %p4300_p12  ;;  %p3591_p8 = scmp.lt.s32.totalorder %s3589_s26, %s3582_s10 }
  0xbe   : > { %p3586_p7 = pneg %p3585_p13  ;;  %p3592_p2 = por %p3591_p8, %p3590_p6 }
  0xc0   : > { %p3593_p4 = pnand %p3592_p2, %p3586_p7 }
  0xc2   : > { %3596 = shalt.err (!%p3593_p4)
}
  0xc3   : > { %3294 = dma.hbm_to_vmem [thread:$0]  (!%p4273_p11), %s4287_s6, 64, %s4290_s24, %s4294_s12  }
  0xc4   : > { %s3946_s18 = smov [#allocation17]   ;;  %s3947_s27 = smov [#allocation20]  }
  0xc5   : > { %s617_s1 = sshll.u32 %s3946_s18, 4  ;;  %s644_s9 = sshll.u32 %s3947_s27, 4  ;;  %s618_s1 = int_to_ptr.vmem [resolvable:$true] %s617_s1  ;;  %s4324_s9 = int_to_ptr.vmem [resolvable:$true] %s644_s9 }
  0xc6   : > { %s3597_s10 = scalar_lea.hbm %s5015_s8, 32  ;;  %p5107_p8 = scmp.ne.s32.totalorder %s5091_s17, 0 }
  0xc7   : > { %p3598_p6 = scmp.ne.s32.totalorder %s5015_s8, %s3597_s10  ;;  %p3604_p10 = scmp.lt.u32.totalorder %s3597_s10, %s5015_s8 }
  0xc9   : > { %p3600_p7 = pnand %p3598_p6, %p5107_p8 }
  0xcb   : > { %p3601_p9 = pneg %p3600_p7 }
  0xcd   : > { %p3606_p0 = pnand %p3604_p10, %p3601_p9 }
  0xcf   : > { %3609 = shalt.err (!%p3606_p0)
}
  0xd0   : > { %s3610_s24 = scalar_lea.vmem %s618_s1, 32  ;;  %p3618_p13 = scmp.lt.s32.totalorder %s618_s1, %s618_s1 }
  0xd1   : > { %p3611_p5 = scmp.ne.s32.totalorder %s618_s1, %s3610_s24  ;;  %p3619_p2 = scmp.lt.s32.totalorder %s3610_s24, %s3610_s24 }
  0xd3   : > { %p3613_p1 = pnand %p3611_p5, %p5107_p8  ;;  %p3620_p4 = por %p3619_p2, %p3618_p13 }
  0xd5   : > { %p3614_p3 = pneg %p3613_p1 }
  0xd7   : > { %p3621_p11 = pnand %p3620_p4, %p3614_p3 }
  0xd9   : > { %3624 = shalt.err (!%p3621_p11)
}
  0xda   : > { %p5108_p6 = scmp.ne.s32.totalorder %s5089_s5, 0  ;;  %s3625_s16 = scalar_lea.hbm %s5018_s11, 32 }
  0xdb   : > { %p3626_p7 = scmp.ne.s32.totalorder %s5018_s11, %s3625_s16  ;;  %p3632_p11 = scmp.lt.u32.totalorder %s3625_s16, %s5018_s11 }
  0xdc   : > { %3275 = dma.hbm_to_vmem [thread:$0]  (!%p5108_p6), %s5015_s8, 32, %s618_s1, [#allocation16]  }
  0xdd   : > { %p3628_p9 = pnand %p3626_p7, %p5107_p8 }
  0xdf   : > { %p3629_p10 = pneg %p3628_p9 }
  0xe1   : > { %p3634_p0 = pnand %p3632_p11, %p3629_p10 }
  0xe3   : > { %3637 = shalt.err (!%p3634_p0)
}
  0xe4   : > { %s3638_s1 = scalar_lea.vmem %s4324_s9, 32  ;;  %p3646_p13 = scmp.lt.s32.totalorder %s4324_s9, %s4324_s9 }
  0xe5   : > { %p3639_p5 = scmp.ne.s32.totalorder %s4324_s9, %s3638_s1  ;;  %p3647_p2 = scmp.lt.s32.totalorder %s3638_s1, %s3638_s1 }
  0xe7   : > { %p3641_p1 = pnand %p3639_p5, %p5107_p8  ;;  %p3648_p4 = por %p3647_p2, %p3646_p13 }
  0xe9   : > { %p3642_p3 = pneg %p3641_p1 }
  0xeb   : > { %p3649_p7 = pnand %p3648_p4, %p3642_p3 }
  0xed   : > { %3652 = shalt.err (!%p3649_p7)
}
  0xee   : > { %3281 = dma.hbm_to_vmem [thread:$0]  (!%p5108_p6), %s5018_s11, 32, %s4324_s9, [#allocation19]  }
  0xef   : > { %s3948_s18 = smov [#allocation23]   ;;  %s2909_s27 = sshll.u32 %s4268_s30, 3 }
  0xf0   : > { %s666_s2 = sshll.u32 %s3948_s18, 4  ;;  %s3653_s10 = scalar_lea.hbm %s5020_s13, 32  ;;  %s667_s2 = int_to_ptr.vmem [resolvable:$true] %s666_s2 }
  0xf1   : > { %p3654_p9 = scmp.ne.s32.totalorder %s5020_s13, %s3653_s10  ;;  %p3660_p0 = scmp.lt.u32.totalorder %s3653_s10, %s5020_s13 }
  0xf3   : > { %p3656_p10 = pnand %p3654_p9, %p5107_p8 }
  0xf5   : > { %p3657_p11 = pneg %p3656_p10 }
  0xf7   : > { %p3662_p5 = pnand %p3660_p0, %p3657_p11 }
  0xf9   : > { %3665 = shalt.err (!%p3662_p5)
}
  0xfa   : > { %s3666_s9 = scalar_lea.vmem %s667_s2, 32  ;;  %p3674_p2 = scmp.lt.s32.totalorder %s667_s2, %s667_s2 }
  0xfb   : > { %p3667_p1 = scmp.ne.s32.totalorder %s667_s2, %s3666_s9  ;;  %p3675_p4 = scmp.lt.s32.totalorder %s3666_s9, %s3666_s9 }
  0xfd   : > { %p3669_p3 = pnand %p3667_p1, %p5107_p8  ;;  %p3676_p7 = por %p3675_p4, %p3674_p2 }
  0xff   : > { %p3670_p13 = pneg %p3669_p3 }
 0x101   : > { %p3677_p12 = pnand %p3676_p7, %p3670_p13 }
 0x103   : > { %3680 = shalt.err (!%p3677_p12)
}
 0x104   : > { %3287 = dma.hbm_to_vmem [thread:$0]  (!%p5108_p6), %s5020_s13, 32, %s667_s2, [#allocation22]  }
 0x105   : > { %s2910_s16 = sshll.u32 %s3933_s3, 7  ;;  %s696_s15 = scalar_lea.vmem [#allocation6], %s2909_s27 }
 0x106   : > { %s703_s10 = sshll.u32 %s696_s15, 4  ;;  %s5109_s6 = sld [smem:[#allocation43_spill]]  ;;  %s704_s10 = int_to_ptr.vmem [resolvable:$true] %s703_s10 }
 0x107   : > { %s693_s5 = scalar_lea.sflag [#allocation7], %s4268_s30  ;;  %p5110_p8 = scmp.ne.s32.totalorder %s5106_s14, 0 }
 0x10c   : > { %s4390_s1 = scalar_lea.hbm %s5109_s6, %s2910_s16  ;;  %s3686_s27 = scalar_lea.hbm %s5109_s6, 256 }
 0x10d   : > { %s3681_s24 = scalar_lea.hbm %s4390_s1, 128  ;;  %p3687_p6 = scmp.lt.u32.totalorder %s4390_s1, %s5109_s6 }
 0x10e   : > { %p3682_p12 = scmp.ne.s32.totalorder %s4390_s1, %s3681_s24  ;;  %p3688_p11 = scmp.lt.u32.totalorder %s3686_s27, %s3681_s24 }
 0x10f   : > { %p3690_p5 = scmp.lt.u32.totalorder %s3681_s24, %s4390_s1 }
 0x110   : > { %p3684_p9 = pnand %p3682_p12, %p5110_p8  ;;  %p3689_p0 = por %p3688_p11, %p3687_p6 }
 0x112   : > { %p3685_p10 = pneg %p3684_p9  ;;  %p3691_p1 = por %p3690_p5, %p3689_p0 }
 0x114   : > { %p3692_p3 = pnand %p3691_p1, %p3685_p10 }
 0x116   : > { %3695 = shalt.err (!%p3692_p3)
}
 0x117   : > { %s3696_s30 = scalar_lea.vmem %s704_s10, 128  ;;  %s3949_s16 = smov [#allocation6]  }
 0x118   : > { %p3697_p13 = scmp.ne.s32.totalorder %s704_s10, %s3696_s30  ;;  %s3701_s15 = sshll.u32 %s3949_s16, 4  ;;  %s3702_s15 = int_to_ptr.vmem [resolvable:$false] %s3701_s15 }
 0x119   : > { %s3703_s17 = scalar_lea.vmem %s3702_s15, 256  ;;  %p3704_p7 = scmp.lt.s32.totalorder %s704_s10, %s3702_s15 }
 0x11a   : > { %p3699_p2 = pnand %p3697_p13, %p5110_p8  ;;  %p3705_p12 = scmp.lt.s32.totalorder %s3703_s17, %s3696_s30 }
 0x11c   : > { %p3700_p4 = pneg %p3699_p2  ;;  %p3706_p9 = por %p3705_p12, %p3704_p7 }
 0x11e   : > { %p3707_p6 = pnand %p3706_p9, %p3700_p4 }
 0x120   : > { %3710 = shalt.err (!%p3707_p6)
}
 0x121   : > { %p5111_p11 = scmp.ne.s32.totalorder %s5103_s20, 0  ;;  %s5112_s2 = sld [smem:[#allocation45_spill]] }
 0x122   : > { %s732_s19 = scalar_lea.vmem [#allocation11], %s4278_s21  ;;  %s5114_s15 = sld [smem:[#allocation46_spill]] }
 0x123   : > { %3291 = dma.hbm_to_vmem [thread:$0]  (!%p5111_p11), %s4390_s1, 128, %s704_s10, %s693_s5  }
 0x124   : > { %s740_s18 = sshll.u32 %s732_s19, 4  ;;  %s741_s18 = int_to_ptr.vmem [resolvable:$true] %s740_s18 }
 0x127   : > { %s5113_s9 = smov %s5112_s2  ;;  %s4414_s27 = scalar_lea.hbm %s5112_s2, %s4281_s23 }
 0x128   : > { %s4421_s17 = scalar_lea.hbm %s5114_s15, %s4281_s23  ;;  %s3711_s6 = scalar_lea.hbm %s4414_s27, 64 }
 0x129   : > { %p3712_p10 = scmp.ne.s32.totalorder %s4414_s27, %s3711_s6  ;;  %s3716_s5 = scalar_lea.hbm %s5113_s9, 128 }
 0x12a   : > { %p3717_p1 = scmp.lt.u32.totalorder %s4414_s27, %s5113_s9  ;;  %p3718_p3 = scmp.lt.u32.totalorder %s3716_s5, %s3711_s6 }
 0x12b   : > { %p3714_p0 = pnand %p3712_p10, %p5110_p8  ;;  %p3720_p2 = scmp.lt.u32.totalorder %s3711_s6, %s4414_s27 }
 0x12c   : > { %p3719_p13 = por %p3718_p3, %p3717_p1 }
 0x12d   : > { %p3715_p5 = pneg %p3714_p0 }
 0x12e   : > { %p3721_p4 = por %p3720_p2, %p3719_p13 }
 0x130   : > { %p3722_p7 = pnand %p3721_p4, %p3715_p5 }
 0x132   : > { %3725 = shalt.err (!%p3722_p7)
}
 0x133   : > { %s3726_s23 = scalar_lea.vmem %s741_s18, 64  ;;  %s3950_s2 = smov [#allocation11]  }
 0x134   : > { %p3727_p12 = scmp.ne.s32.totalorder %s741_s18, %s3726_s23  ;;  %s3731_s19 = sshll.u32 %s3950_s2, 4  ;;  %s3732_s19 = int_to_ptr.vmem [resolvable:$false] %s3731_s19 }
 0x135   : > { %s3733_s30 = scalar_lea.vmem %s3732_s19, 128  ;;  %p3734_p10 = scmp.lt.s32.totalorder %s741_s18, %s3732_s19 }
 0x136   : > { %p3729_p9 = pnand %p3727_p12, %p5110_p8  ;;  %p3735_p0 = scmp.lt.s32.totalorder %s3733_s30, %s3726_s23 }
 0x138   : > { %p3730_p6 = pneg %p3729_p9  ;;  %p3736_p11 = por %p3735_p0, %p3734_p10 }
 0x13a   : > { %p3737_p1 = pnand %p3736_p11, %p3730_p6 }
 0x13c   : > { %3740 = shalt.err (!%p3737_p1)
}
 0x13d   : > { %p5115_p3 = scmp.ne.s32.totalorder %s5103_s20, 0  ;;  %s751_s6 = scalar_lea.vmem [#allocation12], %s4278_s21 }
 0x13e   : > { %s759_s16 = sshll.u32 %s751_s6, 4  ;;  %s5116_s10 = sand.u32 1, %s3937_s28   ;;  %s760_s16 = int_to_ptr.vmem [resolvable:$true] %s759_s16 }
 0x13f   : > { %3297 = dma.hbm_to_vmem [thread:$0]  (!%p5115_p3), %s4414_s27, 64, %s741_s18, %s4294_s12  }
 0x140   : > { %s748_s1 = scalar_lea.sflag [#allocation13], %s5116_s10  ;;  %s3741_s5 = scalar_lea.hbm %s4421_s17, 64 }
 0x141   : > { %p3742_p11 = scmp.ne.s32.totalorder %s4421_s17, %s3741_s5  ;;  %s3746_s23 = scalar_lea.hbm %s5114_s15, 128 }
 0x142   : > { %p3747_p2 = scmp.lt.u32.totalorder %s4421_s17, %s5114_s15  ;;  %p3748_p4 = scmp.lt.u32.totalorder %s3746_s23, %s3741_s5 }
 0x143   : > { %p3744_p5 = pnand %p3742_p11, %p5110_p8  ;;  %p3750_p12 = scmp.lt.u32.totalorder %s3741_s5, %s4421_s17 }
 0x144   : > { %p3749_p7 = por %p3748_p4, %p3747_p2 }
 0x145   : > { %p3745_p13 = pneg %p3744_p5 }
 0x146   : > { %p3751_p9 = por %p3750_p12, %p3749_p7 }
 0x148   : > { %p3752_p6 = pnand %p3751_p9, %p3745_p13 }
 0x14a   : > { %3755 = shalt.err (!%p3752_p6)
}
 0x14b   : > { %s3756_s12 = scalar_lea.vmem %s760_s16, 64  ;;  %s3951_s21 = smov [#allocation12]  }
 0x14c   : > { %p3757_p10 = scmp.ne.s32.totalorder %s760_s16, %s3756_s12  ;;  %s3761_s27 = sshll.u32 %s3951_s21, 4  ;;  %s3762_s27 = int_to_ptr.vmem [resolvable:$false] %s3761_s27 }
 0x14d   : > { %s3763_s18 = scalar_lea.vmem %s3762_s27, 128  ;;  %p3764_p11 = scmp.lt.s32.totalorder %s760_s16, %s3762_s27 }
 0x14e   : > { %p3759_p0 = pnand %p3757_p10, %p5110_p8  ;;  %p3765_p5 = scmp.lt.s32.totalorder %s3763_s18, %s3756_s12 }
 0x150   : > { %p3760_p1 = pneg %p3759_p0  ;;  %p3766_p3 = por %p3765_p5, %p3764_p11 }
 0x152   : > { %p3767_p2 = pnand %p3766_p3, %p3760_p1 }
 0x154   : > { %3770 = shalt.err (!%p3767_p2)
}
 0x155   : > { %p5117_p4 = scmp.ne.s32.totalorder %s5103_s20, 0  ;;  %p5118_p13 = scmp.ne.s32.totalorder %s5088_s0, 0 }
 0x156   : > { %s4464_s14 = sand.u32 (!%p5118_p13), 1, %s3921_s25   ;;  %p5119_p8 = scmp.ne.s32.totalorder (!%p5118_p13), %s5098_s4, 0 }
 0x157   : > { %3300 = dma.hbm_to_vmem [thread:$0]  (!%p5117_p4), %s4421_s17, 64, %s760_s16, %s748_s1  }
 0x158   : > { %768 = sbr.rel (%p5118_p13) target bundleno = 4628 (0x1214), region = 96  ;;  %s5062_s30 = sshll.u32 (!%p5118_p13), %s4464_s14, 3 }
 0x159   : > { %s771_s6 = scalar_lea.sflag (!%p5118_p13), [#allocation7], %s4464_s14  ;;  %s4470_s10 = scalar_lea.vmem (!%p5118_p13), [#allocation6], %s5062_s30 }
 0x15f   : > { %3880 = dma.done.wait (%p5119_p8), %s771_s6, 128  }
 0x160   : > { %3882 = vsyncadd (%p5119_p8), %s771_s6, 4294967168  ;;  %s4477_s0 = sand.u32 1, %s4111_s29   ;;  %s4480_s20 = sshll.u32 %s4464_s14, 2 }
 0x161   : > { %s780_s17 = scalar_lea.sflag [#allocation10], %s4477_s0  ;;  %s783_s16 = scalar_lea.vmem [#allocation9], %s4480_s20 }
 0x162   : > { %3884 = dma.done.wait (%p5119_p8), %s780_s17, 128  }
 0x163   : > { %3886 = vsyncadd (%p5119_p8), %s780_s17, 4294967168  ;;  %s792_s1 = scalar_lea.vmem [#allocation11], %s4480_s20  ;;  %s798_s5 = scalar_lea.sflag [#allocation13], %s4477_s0 }
 0x164   : > { %s801_s26 = scalar_lea.vmem [#allocation12], %s4480_s20 }
 0x165   : > { %3888 = dma.done.wait (%p5119_p8), %s798_s5, 64  }
 0x166   : > { %3890 = vsyncadd (%p5119_p8), %s798_s5, 4294967232  ;;  %p5120_p3 = scmp.eq.s32.totalorder %s4111_s29, 0 }
 0x168   : > { %3892 = dma.done.wait (%p5120_p3), [#allocation13], 256   ;;  %p5121_p7 = pmov %p5120_p3 }
 0x169   : > { %p5122_p12 = pmov %p5120_p3 }
 0x16a   : > { %3894 = vsyncadd (%p5121_p7), [#allocation13], 4294967040 }
 0x16b   : > { %3896 = dma.done.wait (%p5122_p12), [#allocation16], 64   ;;  %p5123_p9 = pmov %p5120_p3 }
 0x16c   : > { %p5124_p6 = pmov %p5120_p3 }
 0x16d   : > { %3898 = vsyncadd (%p5123_p9), [#allocation16], 4294967232 }
 0x16e   : > { %3900 = dma.done.wait (%p5124_p6), [#allocation19], 288   ;;  %p5125_p10 = pmov %p5120_p3 }
 0x16f   : > { %p5126_p0 = pmov %p5120_p3 }
 0x170   : > { %3902 = vsyncadd (%p5125_p10), [#allocation19], 4294967008 }
 0x171   : > { %3904 = dma.done.wait (%p5126_p0), [#allocation22], 48   ;;  %p5127_p1 = pmov %p5126_p0 }
 0x172   : > { %v3952_v0 = vmov 0.0   ;;  %vm3953_vm0 = vmmov 0   ;;  %v3399_v1 = vld [vmem:[#allocation14] sm:$0xff]   ;;  %v3400_v2 = vld [vmem:[#allocation14 + $0x8] sm:$0xff]   ;;  %vm945_vm1 = vcmask 261120   ;;  %s5128_s24 = sld [smem:[#allocation47_spill]]  ;;  %v1148_v10 = vlaneseq }
 0x173   : > { %3906 = vsyncadd (%p5127_p1), [#allocation22], 4294967248  ;;  %3060 = vmatprep.subr.bf16.mxu0 %v3952_v0  ;;  %3064 = vmatprep.mubr.msk.bf16.mxu0 %vm3953_vm0, %v3952_v0  ;;  %v4518_v3 = vld [vmem:[%s4470_s10] sm:$0xff]  ;;  %v1029_v9 = vld [vmem:[%s783_s16] sm:$0xf]  ;;  %s5129_s7 = sld [smem:[#allocation50_spill]] }
 0x174   : > { %3068 = vmatprep.subr.bf16.mxu1 %v3952_v0  ;;  %3072 = vmatprep.mubr.msk.bf16.mxu1 %vm3953_vm0, %v3952_v0  ;;  %v921_v5 = vpack.c.bf16 %v4518_v3, %v4518_v3  ;;  %v3403_v7 = vld [vmem:[#allocation18] sm:$0xff]   ;;  %v3404_v8 = vld [vmem:[#allocation18 + $0x8] sm:$0xff]   ;;  %v4545_v11 = vshrl.u32 %v1148_v10, 7  ;;  %vm990_vm2 = vcmask 60416   ;;  %v4553_v18 = vld [vmem:[#allocation15] sm:$0x3] }
 0x175   : > { %3061 = vmatpush3.bf16.msra.mxu0 %v3399_v1  ;;  %3069 = vmatpush3.bf16.msra.mxu1 %v3403_v7  ;;  %s3954_s21 = smov 104   ;;  %s3955_s27 = smov 120   ;;  %vm1225_vm3 = vcmask 64512   ;;  %v2937_v31 = vld [vmem:[#allocation21] ss:$0 sm:$0xff]  ;;  %v3957_v51 = vmov 0  }
 0x176   : > { %3062 = vmatprep.subr.bf16.mxu0 %v3952_v0  ;;  %3070 = vmatprep.subr.bf16.mxu1 %v3952_v0  ;;  %v4551_v16 = vsub.s32 0, %v4545_v11  ;;  %s3956_s18 = smov 112   ;;  %v1138_v50 = vld [vmem:[%s792_s1] sm:$0xf]  ;;  %s3958_s6 = smov 96   ;;  %vm1475_vm6 = vcmask 1043456  }
 0x177   : > { %vm1139_vm4 = vcmp.ne.bf16.partialorder %v1138_v50, 0  ;;  %s3959_s10 = smov 80   ;;  %s3960_s17 = smov 72   ;;  %vm1670_vm7 = vcmask 130048   ;;  %vm1672_vm8 = vcmask 195584   ;;  %vm2489_vm11 = vcmask 523264  }
 0x178   : > { %v3401_v4 = vld [vmem:[%s5128_s24] sm:$0xff]   ;;  %v3402_v6 = vld [vmem:[%s5128_s24 + $0x8] sm:$0xff]   ;;  %v1151_v21 = vrot.slane %v4553_v18, %v4551_v16  ;;  %v1410_v52 = vsel %vm1139_vm4, 65537, %v3957_v51  ;;  %s3961_s16 = smov 88   ;;  %s2930_s1 = sshll.u32 %s4464_s14, 4 }
 0x179   : > { %3063 = vmatpush3.bf16.msra.mxu0 %v3400_v2  ;;  %3071 = vmatpush3.bf16.msra.mxu1 %v3404_v8  ;;  %v2932_v12 = vld [vmem:[%s5129_s7] ss:$0 sm:$0xff]  ;;  %v1411_v53 = vunpack.c.l.b16 %v1410_v52  ;;  %s4634_s5 = scalar_lea.vmem [#allocation25], %s2930_s1  ;;  %s5063_s19 = smov 16  }
 0x17a   : > { %3076 = vmatprep.subr.bf16.mxu0 %v3952_v0  ;;  %3084 = vmatprep.subr.bf16.mxu1 %v3952_v0  ;;  %s3963_s12 = smov 8   ;;  %s5064_s29 = smov 24  }
 0x17b   : > { %vm4600_vm5 = vcmp.ne.s32.totalorder %v1411_v53, 0  ;;  %s5132_s2 = sld [smem:[#allocation51_spill]]  ;;  %s4782_s20 = scalar_lea.vmem [#allocation27], %s2930_s1 }
 0x17c   : > { %3065 = vmatmul.mubr.msk.bf16.vlgmr.msra.gmra.mrb[0].mxu0 %vm945_vm1, %v921_v5  ;;  %3073 = vmatmul.mubr.msk.bf16.vlgmr.msra.gmra.mrb[0].mxu1 %vm945_vm1, %v1029_v9  ;;  %s5138_s1 = sld [smem:[#allocation54_spill]]  ;;  %s5139_s23 = sld [smem:[#allocation56_spill]] }
 0x17d   : > { %3077 = vmatpush3.bf16.msra.mxu0 %v3401_v4  ;;  %3080 = vmatprep.mubr.msk.bf16.mxu0 %vm3953_vm0, %v3952_v0  ;;  %s5142_s4 = sld [smem:[#allocation39_spill]]  ;;  %p5145_p5 = scmp.ne.s32.totalorder %s5099_s22, 0 }
 0x17e   : > { %3078 = vmatprep.subr.bf16.mxu0 %v3952_v0  ;;  %3086 = vmatprep.mubr.msk.bf16.mxu1 %vm3953_vm0, %v3952_v0 }
 0x181   : > { %3079 = vmatpush3.bf16.msra.mxu0 %v3402_v6  ;;  %s5133_s30 = smov %s5132_s2 }
 0x182   : > { %3090 = vmatprep.subr.bf16.mxu0 %v3952_v0 }
 0x184   : > { %3081 = vmatmul.mubr.msk.bf16.vlgmr.msra.gmra.mrb[4].mxu0 %vm945_vm1, %v921_v5 }
 0x185   : > { %3092 = vmatprep.mubr.msk.bf16.mxu0 %vm3953_vm0, %v3952_v0 }
 0x24f   : > { %v983_v13 = vpop.f32.mrb[0].mxu0  ;;  %v1090_v32 = vpop.f32.mrb[0].mxu1 }
 0x250   : > { %v984_v14 = vadd.f32 %v2932_v12, %v983_v13  ;;  %v3066_v15 = vpop.f32.mrb[1].mxu0  ;;  %v1091_v33 = vadd.f32 %v2937_v31, %v1090_v32  ;;  %v3074_v34 = vpop.f32.mrb[1].mxu1 }
 0x251   : > { %v986_v17 = vpop.f32.mrb[2].mxu0  ;;  %v1093_v35 = vpop.f32.mrb[2].mxu1 }
 0x252   : > { %v4555_v19 = vpack.c.bf16 %v984_v14, %v984_v14  ;;  %v3067_v20 = vpop.f32.mrb[3].mxu0  ;;  %v4575_v36 = vpack.c.bf16 %v1091_v33, %v1091_v33  ;;  %v3075_v37 = vpop.f32.mrb[3].mxu1 }
 0x254   : > { %991 = vst.msk [vmem:[#allocation2] sm:$0xf] %vm990_vm2, %v4555_v19  ;;  %1019 = vrot.lane.b32.xlu1 %v4555_v19, %s3954_s21  ;;  %999 = vrot.lane.b32.xlu0 %v4555_v19, %s3955_s27  ;;  %1097 = vst.msk [vmem:[#allocation4] sm:$0xf] %vm990_vm2, %v4575_v36 }
 0x257   : > { %v1202_v22 = vpop.f32.mrb[4].mxu0 }
 0x258   : > { %1009 = vrot.lane.b32.xlu0 %v4555_v19, %s3956_s18  ;;  %v1203_v23 = vadd.f32 %v1202_v22, %v1151_v21  ;;  %v3082_v24 = vpop.f32.mrb[5].mxu0 }
 0x259   : > { %v1205_v25 = vpop.f32.mrb[6].mxu0 }
 0x25a   : > { %v1208_v26 = vmul.f32 0.35355338, %v1203_v23  ;;  %v3083_v27 = vpop.f32.mrb[7].mxu0 }
 0x25b   : > { %v1217_v28 = vld [vmem:[#allocation2] sm:$0xf] }
 0x25c   : > { %v1209_v29 = vpack.c.bf16 %v1208_v26, %v1208_v26  ;;  %v1230_v30 = vsel %vm1225_vm3, %v1217_v28, 0 }
 0x25d   : > { %3085 = vmatpush3.bf16.xpose.msra.mxu1 %v1230_v30 }
 0x25e   : > { %1211 = vrot.lane.b32.xlu1 %v1209_v29, %s3955_s27  ;;  %1213 = vrot.lane.b32.xlu0 %v1209_v29, %s3956_s18 }
 0x25f   : > { %3096 = vmatprep.subr.bf16.mxu1 %v3952_v0 }
 0x262   : > { %1215 = vrot.lane.b32.xlu1 %v1209_v29, %s3954_s21 }
 0x264   : > { %3087 = vmatmul.mubr.msk.bf16.vlgmr.msra.gmra.mrb[4].mxu1 %vm1225_vm3, %v1209_v29 }
 0x265   : > { %3098 = vmatprep.mubr.msk.bf16.mxu1 %vm3953_vm0, %v3952_v0 }
 0x2c6   : > { %v1020_v38 = vpop.permute.xlu1 %1019  ;;  %v1000_v39 = vpop.permute.xlu0 %999 }
 0x2c7   : > { %1023 = vst.msk [vmem:[#allocation2 + $0xc] sm:$0xf] %vm990_vm2, %v1020_v38  ;;  %1003 = vst.msk [vmem:[#allocation2 + $0x4] sm:$0xf] %vm990_vm2, %v1000_v39 }
 0x2ca   : > { %v1010_v40 = vpop.permute.xlu0 %1009 }
 0x2cb   : > { %1013 = vst.msk [vmem:[#allocation2 + $0x8] sm:$0xf] %vm990_vm2, %v1010_v40 }
 0x2ce   : > { %v1218_v41 = vld [vmem:[#allocation2 + $0x4] sm:$0xf]  ;;  %v1220_v45 = vld [vmem:[#allocation2 + $0xc] sm:$0xf] }
 0x2cf   : > { %v1276_v42 = vsel %vm1225_vm3, %v1218_v41, 0  ;;  %v1368_v47 = vsel %vm1225_vm3, %v1220_v45, 0 }
 0x2d0   : > { %3091 = vmatpush3.bf16.xpose.msra.mxu0 %v1276_v42  ;;  %v1212_v46 = vpop.permute.xlu1 %1211  ;;  %v1214_v48 = vpop.permute.xlu0 %1213 }
 0x2d1   : > { %3102 = vmatprep.subr.bf16.mxu0 %v3952_v0 }
 0x2d2   : > { %v1219_v43 = vld [vmem:[#allocation2 + $0x8] sm:$0xf] }
 0x2d3   : > { %v1322_v44 = vsel %vm1225_vm3, %v1219_v43, 0 }
 0x2d4   : > { %3097 = vmatpush3.bf16.xpose.msra.mxu1 %v1322_v44  ;;  %v1216_v49 = vpop.permute.xlu1 %1215 }
 0x2d5   : > { %3108 = vmatprep.subr.bf16.mxu1 %v3952_v0 }
 0x2d7   : > { %3093 = vmatmul.mubr.msk.bf16.vlgmr.msra.gmra.mrb[8].mxu0 %vm1225_vm3, %v1212_v46 }
 0x2d8   : > { %3103 = vmatpush3.bf16.xpose.msra.mxu0 %v1368_v47  ;;  %3104 = vmatprep.mubr.msk.bf16.mxu0 %vm3953_vm0, %v3952_v0 }
 0x2d9   : > { %3114 = vmatprep.subr.bf16.mxu0 %v3952_v0 }
 0x2db   : > { %3099 = vmatmul.mubr.msk.bf16.vlgmr.msra.gmra.mrb[8].mxu1 %vm1225_vm3, %v1214_v48 }
 0x2dc   : > { %3110 = vmatprep.mubr.msk.bf16.mxu1 %vm3953_vm0, %v3952_v0 }
 0x2df   : > { %3105 = vmatmul.mubr.msk.bf16.vlgmr.msra.gmra.mrb[12].mxu0 %vm1225_vm3, %v1216_v49 }
 0x2e0   : > { %3116 = vmatprep.mubr.msk.bf16.mxu0 %vm3953_vm0, %v3952_v0 }
 0x337   : > { %v1266_v55 = vpop.f32.mrb[4].mxu1 }
 0x338   : > { %v1415_v56 = vsel %vm4600_vm5, %v1266_v55, -1e+09  ;;  %v3088_v57 = vpop.f32.mrb[5].mxu1 }
 0x339   : > { %v1269_v58 = vpop.f32.mrb[6].mxu1  ;;  %v1419_v59 = vsel %vm1225_vm3, %v1415_v56, -inf }
 0x33a   : > { %1420 = vmax.xlane.f32.xlu0 %v1419_v59  ;;  %v3089_v60 = vpop.f32.mrb[7].mxu1 }
 0x3aa   : > { %v1312_v61 = vpop.f32.mrb[8].mxu0 }
 0x3ab   : > { %v1416_v62 = vsel %vm4600_vm5, %v1312_v61, -1e+09  ;;  %v3094_v63 = vpop.f32.mrb[9].mxu0 }
 0x3ac   : > { %v1315_v1 = vpop.f32.mrb[10].mxu0  ;;  %v1422_v2 = vsel %vm1225_vm3, %v1416_v62, -inf }
 0x3ad   : > { %1423 = vmax.xlane.f32.xlu1 %v1422_v2  ;;  %v3095_v4 = vpop.f32.mrb[11].mxu0 }
 0x3ae   : > { %v1358_v5 = vpop.f32.mrb[8].mxu1 }
 0x3af   : > { %v1417_v6 = vsel %vm4600_vm5, %v1358_v5, -1e+09  ;;  %v3100_v7 = vpop.f32.mrb[9].mxu1 }
 0x3b0   : > { %v1361_v8 = vpop.f32.mrb[10].mxu1  ;;  %v1425_v9 = vsel %vm1225_vm3, %v1417_v6, -inf }
 0x3b1   : > { %1426 = vmax.xlane.f32.xlu0 %v1425_v9  ;;  %v3101_v10 = vpop.f32.mrb[11].mxu1 }
 0x3b2   : > { %v1404_v12 = vpop.f32.mrb[12].mxu0 }
 0x3b3   : > { %v1418_v13 = vsel %vm4600_vm5, %v1404_v12, -1e+09  ;;  %v3106_v14 = vpop.f32.mrb[13].mxu0 }
 0x3b4   : > { %v1407_v15 = vpop.f32.mrb[14].mxu0  ;;  %v1428_v17 = vsel %vm1225_vm3, %v1418_v13, -inf  ;;  %v3406_v14 = vld [vmem:[%s5128_s24 + $0x18] sm:$0xff]  }
 0x3b5   : > { %1429 = vmax.xlane.f32.xlu0 %v1428_v17  ;;  %v3107_v20 = vpop.f32.mrb[15].mxu0 }
 0x3be   : > { %995 = vrot.lane.b32.xlu1 %v4555_v19, %s3958_s6 }
 0x3c7   : > { %v1421_v21 = vpop.xlane.xlu0 %1420 }
 0x3c8   : > { %v1431_v22 = vsub.f32 %v1415_v56, %v1421_v21 }
 0x3ca   : > { %v1435_v23 = vmul.f32 1.442695, %v1431_v22 }
 0x3cc   : > { %3417 = vpow2.f32 %v1435_v23 }
 0x3d6   : > { %v3418_v24 = vpop.eup %3417 }
 0x3d7   : > { %v1443_v25 = vsel %vm1225_vm3, %v3418_v24, 0.0 }
 0x3e2   : > { %1444 = vadd.xlane.f32.xlu1 %v1443_v25 }
 0x43a   : > { %v1424_v26 = vpop.xlane.xlu1 %1423 }
 0x43b   : > { %v1432_v27 = vsub.f32 %v1416_v62, %v1424_v26 }
 0x43d   : > { %v1437_v28 = vmul.f32 1.442695, %v1432_v27 }
 0x43e   : > { %v1427_v29 = vpop.xlane.xlu0 %1426  ;;  %v996_v30 = vpop.permute.xlu1 %995 }
 0x43f   : > { %3419 = vpow2.f32 %v1437_v28  ;;  %v1433_v31 = vsub.f32 %v1417_v6, %v1427_v29  ;;  %998 = vst.msk [vmem:[#allocation3] sm:$0xf] %vm990_vm2, %v996_v30 }
 0x441   : > { %v1439_v32 = vmul.f32 1.442695, %v1433_v31 }
 0x442   : > { %v1430_v33 = vpop.xlane.xlu0 %1429 }
 0x443   : > { %3421 = vpow2.f32 %v1439_v32  ;;  %v1434_v34 = vsub.f32 %v1418_v13, %v1430_v33  ;;  %v3405_v13 = vld [vmem:[%s5128_s24 + $0x10] sm:$0xff]  }
 0x445   : > { %v1441_v35 = vmul.f32 1.442695, %v1434_v34 }
 0x446   : > { %v1221_v37 = vld [vmem:[#allocation3] sm:$0xf] }
 0x447   : > { %3423 = vpow2.f32 %v1441_v35  ;;  %v1477_v38 = vsel %vm1475_vm6, %v1221_v37, 0  ;;  %v1839_v37 = vld [vmem:[#allocation4] sm:$0xf] }
 0x448   : > { %3109 = vmatpush3.bf16.msra.mxu1 %v1477_v38 }
 0x449   : > { %v3420_v39 = vpop.eup %3419  ;;  %3120 = vmatprep.subr.bf16.mxu1 %v3952_v0 }
 0x44a   : > { %v1446_v40 = vsel %vm1225_vm3, %v3420_v39, 0.0 }
 0x44b   : > { %1447 = vadd.xlane.f32.xlu0 %v1446_v40  ;;  %v4685_v40 = vsub.s32 1, %v4545_v11 }
 0x44d   : > { %v3422_v41 = vpop.eup %3421 }
 0x44e   : > { %v1449_v42 = vsel %vm1225_vm3, %v3422_v41, 0.0 }
 0x44f   : > { %1450 = vadd.xlane.f32.xlu1 %v1449_v42 }
 0x451   : > { %v3424_v43 = vpop.eup %3423 }
 0x452   : > { %v1452_v44 = vsel %vm1225_vm3, %v3424_v43, 0.0 }
 0x453   : > { %1453 = vadd.xlane.f32.xlu0 %v1452_v44 }
 0x460   : > { %1014 = vrot.lane.b32.xlu1 %v4555_v19, %s3959_s10 }
 0x464   : > { %1024 = vrot.lane.b32.xlu1 %v4555_v19, %s3960_s17 }
 0x469   : > { %1004 = vrot.lane.b32.xlu0 %v4555_v19, %s3961_s16 }
 0x46f   : > { %v1445_v45 = vpop.xlane.xlu1 %1444 }
 0x470   : > { %3425 = vrcp.f32 %v1445_v45 }
 0x47a   : > { %v3426_v46 = vpop.eup %3425 }
 0x47b   : > { %v1459_v47 = vmul.f32 %v3426_v46, %v3418_v24 }
 0x47d   : > { %v1463_v48 = vpack.c.bf16 %v1459_v47, %v1459_v47 }
 0x47f   : > { %1468 = vst.msk [vmem:[%s4634_s5] sm:$0xf] %vm990_vm2, %v1463_v48  ;;  %3111 = vmatmul.mubr.msk.bf16.vlgmr.msra.gmra.mrb[12].mxu1 %vm1225_vm3, %v1463_v48 }
 0x480   : > { %3122 = vmatprep.mubr.msk.bf16.mxu1 %vm3953_vm0, %v3952_v0 }
 0x4d8   : > { %v1448_v49 = vpop.xlane.xlu0 %1447 }
 0x4d9   : > { %3427 = vrcp.f32 %v1448_v49 }
 0x4dc   : > { %v1451_v19 = vpop.xlane.xlu1 %1450 }
 0x4dd   : > { %3429 = vrcp.f32 %v1451_v19 }
 0x4e0   : > { %v1015_v50 = vpop.permute.xlu1 %1014  ;;  %v1454_v52 = vpop.xlane.xlu0 %1453 }
 0x4e1   : > { %1018 = vst.msk [vmem:[#allocation3 + $0x8] sm:$0xf] %vm990_vm2, %v1015_v50  ;;  %3431 = vrcp.f32 %v1454_v52 }
 0x4e3   : > { %v3428_v53 = vpop.eup %3427 }
 0x4e4   : > { %v1460_v54 = vmul.f32 %v3428_v53, %v3420_v39  ;;  %v1025_v55 = vpop.permute.xlu1 %1024  ;;  %v1005_v56 = vpop.permute.xlu0 %1004  ;;  %v1851_v39 = vsel %vm1225_vm3, %v1839_v37, 0  ;;  %v3407_v53 = vld [vmem:[%s5132_s2] sm:$0xff]   ;;  %s3000_s2 = sshll.u32 %s5142_s4, 8 }
 0x4e5   : > { %1028 = vst.msk [vmem:[#allocation3 + $0xc] sm:$0xf] %vm990_vm2, %v1025_v55  ;;  %1008 = vst.msk [vmem:[#allocation3 + $0x4] sm:$0xf] %vm990_vm2, %v1005_v56 }
 0x4e6   : > { %v1464_v57 = vpack.c.bf16 %v1460_v54, %v1460_v54  ;;  %v3408_v54 = vld [vmem:[%s5133_s30 + $0x8] sm:$0xff]  }
 0x4e7   : > { %v3430_v58 = vpop.eup %3429 }
 0x4e8   : > { %v1461_v59 = vmul.f32 %v3430_v58, %v3422_v41  ;;  %v1223_v60 = vld [vmem:[#allocation3 + $0x8] sm:$0xf]  ;;  %1469 = vst.msk [vmem:[%s4634_s5 + $0x4] sm:$0xf] %vm990_vm2, %v1464_v57  ;;  %v1683_v41 = vrot.slane %v4553_v18, %v4685_v40 }
 0x4e9   : > { %v1569_v61 = vsel %vm1475_vm6, %v1223_v60, 0 }
 0x4ea   : > { %3121 = vmatpush3.bf16.msra.mxu1 %v1569_v61  ;;  %v1465_v62 = vpack.c.bf16 %v1461_v59, %v1461_v59  ;;  %v1740_v59 = vld [vmem:[#allocation17] sm:$0x3] }
 0x4eb   : > { %v3432_v63 = vpop.eup %3431  ;;  %3132 = vmatprep.subr.bf16.mxu1 %v3952_v0  ;;  %v1758_v60 = vrot.slane %v1740_v59, %v4551_v16 }
 0x4ec   : > { %v1462_v1 = vmul.f32 %v3432_v63, %v3424_v43  ;;  %1470 = vst.msk [vmem:[%s4634_s5 + $0x8] sm:$0xf] %vm990_vm2, %v1465_v62  ;;  %v1222_v2 = vld [vmem:[#allocation3 + $0x4] sm:$0xf]  ;;  %v1224_v5 = vld [vmem:[#allocation3 + $0xc] sm:$0xf]  ;;  %v1763_v63 = vrot.slane %v1740_v59, %v4685_v40 }
 0x4ed   : > { %3123 = vmatmul.mubr.msk.bf16.vlgmr.msra.gmra.mrb[16].mxu1 %vm1225_vm3, %v1465_v62  ;;  %v1523_v4 = vsel %vm1475_vm6, %v1222_v2, 0  ;;  %v1615_v7 = vsel %vm1475_vm6, %v1224_v5, 0 }
 0x4ee   : > { %3115 = vmatpush3.bf16.msra.mxu0 %v1523_v4  ;;  %v1466_v6 = vpack.c.bf16 %v1462_v1, %v1462_v1  ;;  %3136 = vmatprep.mubr.msk.bf16.mxu1 %vm3953_vm0, %v3952_v0 }
 0x4ef   : > { %3126 = vmatprep.subr.bf16.mxu0 %v3952_v0  ;;  %3133 = vmatpush3.bf16.msra.mxu1 %v3405_v13 }
 0x4f0   : > { %1471 = vst.msk [vmem:[%s4634_s5 + $0xc] sm:$0xf] %vm990_vm2, %v1466_v6  ;;  %3134 = vmatprep.subr.bf16.mxu1 %v3952_v0 }
 0x4f1   : > { %3117 = vmatmul.mubr.msk.bf16.vlgmr.msra.gmra.mrb[16].mxu0 %vm1225_vm3, %v1464_v57 }
 0x4f2   : > { %3127 = vmatpush3.bf16.msra.mxu0 %v1615_v7  ;;  %3128 = vmatprep.mubr.msk.bf16.mxu0 %vm3953_vm0, %v3952_v0  ;;  %v4720_v7 = vld [vmem:[#allocation20] sm:$0x3] }
 0x4f3   : > { %3140 = vmatprep.subr.bf16.mxu0 %v3952_v0  ;;  %3135 = vmatpush3.bf16.msra.mxu1 %v3406_v14 }
 0x4f4   : > { %3148 = vmatprep.subr.bf16.mxu1 %v3952_v0 }
 0x4f9   : > { %3129 = vmatmul.mubr.msk.bf16.vlgmr.msra.gmra.mrb[20].mxu0 %vm1225_vm3, %v1466_v6 }
 0x4fa   : > { %3144 = vmatprep.mubr.msk.bf16.mxu0 %vm3953_vm0, %v3952_v0  ;;  %3141 = vmatpush3.bf16.msra.mxu0 %v3407_v53 }
 0x4fb   : > { %3142 = vmatprep.subr.bf16.mxu0 %v3952_v0 }
 0x4fe   : > { %3143 = vmatpush3.bf16.msra.mxu0 %v3408_v54 }
 0x4ff   : > { %3154 = vmatprep.subr.bf16.mxu0 %v3952_v0 }
 0x552   : > { %v1513_v8 = vpop.f32.mrb[12].mxu1 }
 0x553   : > { %v3112_v9 = vpop.f32.mrb[13].mxu1 }
 0x554   : > { %v1516_v10 = vpop.f32.mrb[14].mxu1 }
 0x555   : > { %v3113_v12 = vpop.f32.mrb[15].mxu1 }
 0x5c0   : > { %v1605_v15 = vpop.f32.mrb[16].mxu1 }
 0x5c1   : > { %1662 = vrot.lane.b32.xlu1 %v1605_v15, %s5063_s19  ;;  %v3124_v17 = vpop.f32.mrb[17].mxu1  ;;  %s3965_s19 = smov [#allocation25]  }
 0x5c2   : > { %v1608_v20 = vpop.f32.mrb[18].mxu1 }
 0x5c3   : > { %v3125_v21 = vpop.f32.mrb[19].mxu1 }
 0x5c4   : > { %v1559_v22 = vpop.f32.mrb[16].mxu0 }
 0x5c5   : > { %1658 = vrot.lane.b32.xlu0 %v1559_v22, %s3963_s12  ;;  %v3118_v23 = vpop.f32.mrb[17].mxu0 }
 0x5c6   : > { %v1562_v24 = vpop.f32.mrb[18].mxu0 }
 0x5c7   : > { %v3119_v25 = vpop.f32.mrb[19].mxu0 }
 0x5cc   : > { %v1651_v26 = vpop.f32.mrb[20].mxu0 }
 0x5cd   : > { %1666 = vrot.lane.b32.xlu0 %v1651_v26, %s5064_s29  ;;  %v3130_v27 = vpop.f32.mrb[21].mxu0  ;;  %s5141_s29 = sld [smem:[#allocation57_spill]] }
 0x5ce   : > { %v1654_v28 = vpop.f32.mrb[22].mxu0  ;;  %v1140_v27 = vld [vmem:[%s801_s26] sm:$0xf] }
 0x5cf   : > { %v3131_v29 = vpop.f32.mrb[23].mxu0  ;;  %vm1141_vm9 = vcmp.ne.bf16.partialorder %v1140_v27, 0 }
 0x5d0   : > { %v2031_v28 = vsel %vm1141_vm9, 65537, %v3957_v51 }
 0x5d1   : > { %v2032_v29 = vunpack.c.l.b16 %v2031_v28 }
 0x5d3   : > { %vm4746_vm10 = vcmp.ne.s32.totalorder %v2032_v29, 0 }
 0x633   : > { %v1663_v32 = vpop.permute.xlu1 %1662 }
 0x637   : > { %v1659_v30 = vpop.permute.xlu0 %1658 }
 0x638   : > { %v1669_v31 = vsel %vm1225_vm3, %v1513_v8, %v1659_v30  ;;  %v1774_v8 = vrot.slane %v4720_v7, %v4551_v16 }
 0x639   : > { %v1671_v33 = vsel %vm1670_vm7, %v1669_v31, %v1663_v32 }
 0x63f   : > { %v1667_v34 = vpop.permute.xlu0 %1666 }
 0x640   : > { %v1673_v35 = vsel %vm1672_vm8, %v1671_v33, %v1667_v34 }
 0x641   : > { %v1674_v38 = vpack.c.bf16 %v1673_v35, %v1673_v35 }
 0x643   : > { %3137 = vmatmul.mubr.msk.bf16.vlgmr.msra.gmra.mrb[20].mxu1 %vm945_vm1, %v1674_v38 }
 0x644   : > { %3149 = vmatpush3.bf16.xpose.msra.mxu1 %v1851_v39  ;;  %3150 = vmatprep.mubr.msk.bf16.mxu1 %vm3953_vm0, %v3952_v0 }
 0x645   : > { %3160 = vmatprep.subr.bf16.mxu1 %v3952_v0 }
 0x716   : > { %v1733_v42 = vpop.f32.mrb[20].mxu1 }
 0x717   : > { %v1734_v43 = vadd.f32 %v1733_v42, %v1683_v41  ;;  %v3138_v44 = vpop.f32.mrb[21].mxu1 }
 0x718   : > { %v1736_v45 = vpop.f32.mrb[22].mxu1 }
 0x719   : > { %v3139_v46 = vpop.f32.mrb[23].mxu1  ;;  %v1739_v47 = vadd.f32 %v1734_v43, %v4518_v3 }
 0x71b   : > { %v1741_v48 = vsel %vm945_vm1, %v1739_v47, 0.0 }
 0x71c   : > { %1742 = vadd.xlane.f32.xlu1 %v1741_v48 }
 0x72d   : > { %1115 = vrot.lane.b32.xlu1 %v4575_v36, %s3956_s18 }
 0x731   : > { %1125 = vrot.lane.b32.xlu1 %v4575_v36, %s3954_s21 }
 0x7a9   : > { %v1743_v11 = vpop.xlane.xlu1 %1742 }
 0x7aa   : > { %v1745_v49 = vmul.f32 0.03125, %v1743_v11 }
 0x7ac   : > { %v1746_v19 = vsub.f32 %v1739_v47, %v1745_v49 }
 0x7ad   : > { %v1116_v18 = vpop.permute.xlu1 %1115 }
 0x7ae   : > { %1119 = vst.msk [vmem:[#allocation4 + $0x8] sm:$0xf] %vm990_vm2, %v1116_v18  ;;  %v1747_v50 = vmul.f32 %v1746_v19, %v1746_v19 }
 0x7b0   : > { %v1748_v52 = vsel %vm945_vm1, %v1747_v50, 0.0 }
 0x7b1   : > { %1749 = vadd.xlane.f32.xlu0 %v1748_v52  ;;  %v1126_v3 = vpop.permute.xlu1 %1125 }
 0x7b2   : > { %1129 = vst.msk [vmem:[#allocation4 + $0xc] sm:$0xf] %vm990_vm2, %v1126_v3 }
 0x7b5   : > { %v1841_v20 = vld [vmem:[#allocation4 + $0x8] sm:$0xf] }
 0x7b6   : > { %v1943_v21 = vsel %vm1225_vm3, %v1841_v20, 0 }
 0x7b9   : > { %v1842_v22 = vld [vmem:[#allocation4 + $0xc] sm:$0xf] }
 0x7ba   : > { %v1989_v25 = vsel %vm1225_vm3, %v1842_v22, 0 }
 0x7c7   : > { %1105 = vrot.lane.b32.xlu0 %v4575_v36, %s3955_s27 }
 0x83e   : > { %v1750_v55 = vpop.xlane.xlu0 %1749 }
 0x83f   : > { %v1751_v56 = vmul.f32 0.03125, %v1750_v55 }
 0x841   : > { %v1752_v57 = vadd.f32 1e-05, %v1751_v56 }
 0x842   : > { %v1106_v58 = vpop.permute.xlu0 %1105 }
 0x843   : > { %3433 = vrsqrt.f32 %v1752_v57  ;;  %1109 = vst.msk [vmem:[#allocation4 + $0x4] sm:$0xf] %vm990_vm2, %v1106_v58 }
 0x84a   : > { %v1840_v4 = vld [vmem:[#allocation4 + $0x4] sm:$0xf] }
 0x84b   : > { %v1897_v6 = vsel %vm1225_vm3, %v1840_v4, 0 }
 0x84d   : > { %v3434_v61 = vpop.eup %3433 }
 0x84e   : > { %v1754_v62 = vmul.f32 %v3434_v61, %v1746_v19 }
 0x850   : > { %v1759_v1 = vmul.f32 %v1758_v60, %v1754_v62 }
 0x852   : > { %v4711_v2 = vadd.f32 %v1763_v63, %v1759_v1 }
 0x854   : > { %v1766_v5 = vpack.c.bf16 %v4711_v2, %v4711_v2 }
 0x856   : > { %3145 = vmatmul.mubr.msk.bf16.vlgmr.msra.gmra.mrb[24].mxu0 %vm945_vm1, %v1766_v5 }
 0x857   : > { %3155 = vmatpush3.bf16.xpose.msra.mxu0 %v1897_v6  ;;  %3156 = vmatprep.mubr.msk.bf16.mxu0 %vm3953_vm0, %v3952_v0 }
 0x858   : > { %3166 = vmatprep.subr.bf16.mxu0 %v3952_v0 }
 0x929   : > { %v1824_v9 = vpop.f32.mrb[24].mxu0 }
 0x92a   : > { %v1825_v10 = vadd.f32 %v1824_v9, %v1774_v8  ;;  %v3146_v12 = vpop.f32.mrb[25].mxu0 }
 0x92b   : > { %v1827_v13 = vpop.f32.mrb[26].mxu0 }
 0x92c   : > { %v1830_v14 = vmul.f32 0.35355338, %v1825_v10  ;;  %v3147_v15 = vpop.f32.mrb[27].mxu0 }
 0x92e   : > { %v1831_v17 = vpack.c.bf16 %v1830_v14, %v1830_v14 }
 0x930   : > { %1835 = vrot.lane.b32.xlu1 %v1831_v17, %s3956_s18  ;;  %1833 = vrot.lane.b32.xlu0 %v1831_v17, %s3955_s27  ;;  %s5143_s27 = sld [smem:[#allocation60_spill]] }
 0x931   : > { %3151 = vmatmul.mubr.msk.bf16.vlgmr.msra.gmra.mrb[24].mxu1 %vm1225_vm3, %v1831_v17 }
 0x932   : > { %3161 = vmatpush3.bf16.xpose.msra.mxu1 %v1943_v21  ;;  %3162 = vmatprep.mubr.msk.bf16.mxu1 %vm3953_vm0, %v3952_v0 }
 0x933   : > { %3172 = vmatprep.subr.bf16.mxu1 %v3952_v0 }
 0x934   : > { %1837 = vrot.lane.b32.xlu0 %v1831_v17, %s3954_s21 }
 0x936   : > { %s5144_s18 = smov %s5143_s27 }
 0x9a2   : > { %v1836_v23 = vpop.permute.xlu1 %1835  ;;  %v1834_v24 = vpop.permute.xlu0 %1833 }
 0x9a3   : > { %3157 = vmatmul.mubr.msk.bf16.vlgmr.msra.gmra.mrb[28].mxu0 %vm1225_vm3, %v1834_v24  ;;  %3163 = vmatmul.mubr.msk.bf16.vlgmr.msra.gmra.mrb[28].mxu1 %vm1225_vm3, %v1836_v23 }
 0x9a4   : > { %3167 = vmatpush3.bf16.xpose.msra.mxu0 %v1989_v25  ;;  %3168 = vmatprep.mubr.msk.bf16.mxu0 %vm3953_vm0, %v3952_v0 }
 0x9a5   : > { %3178 = vmatprep.subr.bf16.mxu0 %v3952_v0  ;;  %3174 = vmatprep.mubr.msk.bf16.mxu1 %vm3953_vm0, %v3952_v0 }
 0x9a6   : > { %v1838_v26 = vpop.permute.xlu0 %1837 }
 0x9ab   : > { %3169 = vmatmul.mubr.msk.bf16.vlgmr.msra.gmra.mrb[32].mxu0 %vm1225_vm3, %v1838_v26 }
 0x9ac   : > { %3180 = vmatprep.mubr.msk.bf16.mxu0 %vm3953_vm0, %v3952_v0 }
 0xa04   : > { %v1887_v31 = vpop.f32.mrb[24].mxu1 }
 0xa05   : > { %v2036_v32 = vsel %vm4746_vm10, %v1887_v31, -1e+09  ;;  %v3152_v33 = vpop.f32.mrb[25].mxu1 }
 0xa06   : > { %v1890_v34 = vpop.f32.mrb[26].mxu1  ;;  %v2040_v35 = vsel %vm1225_vm3, %v2036_v32, -inf }
 0xa07   : > { %2041 = vmax.xlane.f32.xlu1 %v2040_v35  ;;  %v3153_v37 = vpop.f32.mrb[27].mxu1 }
 0xa76   : > { %v1933_v38 = vpop.f32.mrb[28].mxu0  ;;  %v1979_v39 = vpop.f32.mrb[28].mxu1 }
 0xa77   : > { %v2037_v51 = vsel %vm4746_vm10, %v1933_v38, -1e+09  ;;  %v3158_v41 = vpop.f32.mrb[29].mxu0  ;;  %v3164_v42 = vpop.f32.mrb[29].mxu1  ;;  %v2038_v46 = vsel %vm4746_vm10, %v1979_v39, -1e+09 }
 0xa78   : > { %v1936_v43 = vpop.f32.mrb[30].mxu0  ;;  %v1982_v44 = vpop.f32.mrb[30].mxu1  ;;  %v2043_v45 = vsel %vm1225_vm3, %v2037_v51, -inf  ;;  %v2046_v11 = vsel %vm1225_vm3, %v2038_v46, -inf }
 0xa79   : > { %v3165_v47 = vpop.f32.mrb[31].mxu1  ;;  %2044 = vmax.xlane.f32.xlu0 %v2043_v45  ;;  %v3159_v48 = vpop.f32.mrb[31].mxu0 }
 0xa7d   : > { %2047 = vmax.xlane.f32.xlu0 %v2046_v11  ;;  %v3409_v11 = vld [vmem:[%s5133_s30 + $0x10] sm:$0xff]  }
 0xa7e   : > { %v2025_v49 = vpop.f32.mrb[32].mxu0 }
 0xa7f   : > { %v2039_v19 = vsel %vm4746_vm10, %v2025_v49, -1e+09  ;;  %v3170_v18 = vpop.f32.mrb[33].mxu0  ;;  %v3410_v49 = vld [vmem:[%s5133_s30 + $0x18] sm:$0xff]  }
 0xa80   : > { %v2028_v50 = vpop.f32.mrb[34].mxu0  ;;  %v2049_v52 = vsel %vm1225_vm3, %v2039_v19, -inf }
 0xa81   : > { %2050 = vmax.xlane.f32.xlu1 %v2049_v52  ;;  %v3171_v3 = vpop.f32.mrb[35].mxu0 }
 0xa92   : > { %1110 = vrot.lane.b32.xlu1 %v4575_v36, %s3961_s16  ;;  %s5140_s16 = sld [smem:[#allocation55_spill]] }
 0xa93   : > { %1101 = vrot.lane.b32.xlu0 %v4575_v36, %s3958_s6  ;;  %s5136_s6 = smov 24  }
 0xa94   : > { %v2042_v53 = vpop.xlane.xlu1 %2041 }
 0xa95   : > { %v2052_v54 = vsub.f32 %v2036_v32, %v2042_v53 }
 0xa97   : > { %v2056_v55 = vmul.f32 1.442695, %v2052_v54 }
 0xa99   : > { %3435 = vpow2.f32 %v2056_v55 }
 0xaa3   : > { %v3436_v56 = vpop.eup %3435 }
 0xaa4   : > { %v2064_v57 = vsel %vm1225_vm3, %v3436_v56, 0.0 }
 0xab2   : > { %2065 = vadd.xlane.f32.xlu0 %v2064_v57 }
 0xb06   : > { %v2045_v58 = vpop.xlane.xlu0 %2044 }
 0xb07   : > { %v2053_v59 = vsub.f32 %v2037_v51, %v2045_v58 }
 0xb09   : > { %v2058_v60 = vmul.f32 1.442695, %v2053_v59 }
 0xb0a   : > { %v2048_v61 = vpop.xlane.xlu0 %2047 }
 0xb0b   : > { %3437 = vpow2.f32 %v2058_v60  ;;  %v2054_v62 = vsub.f32 %v2038_v46, %v2048_v61 }
 0xb0d   : > { %v2060_v63 = vmul.f32 1.442695, %v2054_v62 }
 0xb0e   : > { %v1102_v1 = vpop.permute.xlu0 %1101  ;;  %v2051_v4 = vpop.xlane.xlu1 %2050 }
 0xb0f   : > { %3439 = vpow2.f32 %v2060_v63  ;;  %1104 = vst.msk [vmem:[#allocation5] sm:$0xf] %vm990_vm2, %v1102_v1  ;;  %v2055_v5 = vsub.f32 %v2039_v19, %v2051_v4 }
 0xb11   : > { %v2062_v6 = vmul.f32 1.442695, %v2055_v5 }
 0xb12   : > { %v1111_v8 = vpop.permute.xlu1 %1110 }
 0xb13   : > { %3441 = vpow2.f32 %v2062_v6  ;;  %1114 = vst.msk [vmem:[#allocation5 + $0x4] sm:$0xf] %vm990_vm2, %v1111_v8  ;;  %v2300_v6 = vrot.slane %v4720_v7, %v4685_v40  ;;  %v3411_v7 = vld [vmem:[%s5138_s1] sm:$0xff]  }
 0xb15   : > { %v3438_v9 = vpop.eup %3437 }
 0xb16   : > { %v2067_v10 = vsel %vm1225_vm3, %v3438_v9, 0.0  ;;  %v1843_v12 = vld [vmem:[#allocation5] sm:$0xf] }
 0xb17   : > { %2068 = vadd.xlane.f32.xlu1 %v2067_v10  ;;  %v2096_v13 = vsel %vm1475_vm6, %v1843_v12, 0 }
 0xb18   : > { %3173 = vmatpush3.bf16.msra.mxu1 %v2096_v13 }
 0xb19   : > { %v3440_v14 = vpop.eup %3439  ;;  %3184 = vmatprep.subr.bf16.mxu1 %v3952_v0 }
 0xb1a   : > { %v2070_v15 = vsel %vm1225_vm3, %v3440_v14, 0.0  ;;  %v1844_v17 = vld [vmem:[#allocation5 + $0x4] sm:$0xf] }
 0xb1b   : > { %2071 = vadd.xlane.f32.xlu0 %v2070_v15  ;;  %v2142_v20 = vsel %vm1475_vm6, %v1844_v17, 0 }
 0xb1c   : > { %3179 = vmatpush3.bf16.msra.mxu0 %v2142_v20 }
 0xb1d   : > { %v3442_v21 = vpop.eup %3441  ;;  %3190 = vmatprep.subr.bf16.mxu0 %v3952_v0 }
 0xb1e   : > { %v2073_v22 = vsel %vm1225_vm3, %v3442_v21, 0.0 }
 0xb1f   : > { %2074 = vadd.xlane.f32.xlu1 %v2073_v22 }
 0xb30   : > { %1120 = vrot.lane.b32.xlu1 %v4575_v36, %s3959_s10  ;;  %s5137_s10 = smov 16  }
 0xb31   : > { %1130 = vrot.lane.b32.xlu0 %v4575_v36, %s3960_s17  ;;  %s2565_s17 = scalar_lea.sflag [#allocation26], %s4477_s0 }
 0xb3f   : > { %v2066_v23 = vpop.xlane.xlu0 %2065 }
 0xb40   : > { %3443 = vrcp.f32 %v2066_v23 }
 0xb4a   : > { %v3444_v24 = vpop.eup %3443 }
 0xb4b   : > { %v2080_v25 = vmul.f32 %v3444_v24, %v3436_v56  ;;  %v3412_v24 = vld [vmem:[%s5138_s1 + $0x8] sm:$0xff]  }
 0xb4d   : > { %v2084_v26 = vpack.c.bf16 %v2080_v25, %v2080_v25  ;;  %v3414_v25 = vld [vmem:[%s5139_s23 + $0x8] sm:$0xff]  }
 0xb4f   : > { %2088 = vst.msk [vmem:[%s4782_s20] sm:$0xf] %vm990_vm2, %v2084_v26  ;;  %3175 = vmatmul.mubr.msk.bf16.vlgmr.msra.gmra.mrb[32].mxu1 %vm1225_vm3, %v2084_v26 }
 0xb50   : > { %3186 = vmatprep.mubr.msk.bf16.mxu1 %vm3953_vm0, %v3952_v0 }
 0xba4   : > { %v2069_v27 = vpop.xlane.xlu1 %2068 }
 0xba5   : > { %3445 = vrcp.f32 %v2069_v27 }
 0xba8   : > { %v2072_v36 = vpop.xlane.xlu0 %2071 }
 0xba9   : > { %3447 = vrcp.f32 %v2072_v36 }
 0xbac   : > { %v1131_v28 = vpop.permute.xlu0 %1130  ;;  %v2075_v29 = vpop.xlane.xlu1 %2074 }
 0xbad   : > { %1134 = vst.msk [vmem:[#allocation5 + $0xc] sm:$0xf] %vm990_vm2, %v1131_v28  ;;  %3449 = vrcp.f32 %v2075_v29  ;;  %v2357_v28 = vld [vmem:[#allocation23] sm:$0x3] }
 0xbae   : > { %v2374_v29 = vrot.slane %v2357_v28, %v4551_v16 }
 0xbaf   : > { %v3446_v30 = vpop.eup %3445 }
 0xbb0   : > { %v2081_v31 = vmul.f32 %v3446_v30, %v3438_v9  ;;  %v1121_v32 = vpop.permute.xlu1 %1120 }
 0xbb1   : > { %1124 = vst.msk [vmem:[#allocation5 + $0x8] sm:$0xf] %vm990_vm2, %v1121_v32  ;;  %v2379_v32 = vrot.slane %v2357_v28, %v4685_v40 }
 0xbb2   : > { %v2085_v33 = vpack.c.bf16 %v2081_v31, %v2081_v31 }
 0xbb3   : > { %v3448_v34 = vpop.eup %3447 }
 0xbb4   : > { %v2082_v35 = vmul.f32 %v3448_v34, %v3440_v14  ;;  %2089 = vst.msk [vmem:[%s4782_s20 + $0x4] sm:$0xf] %vm990_vm2, %v2085_v33  ;;  %3181 = vmatmul.mubr.msk.bf16.vlgmr.msra.gmra.mrb[36].mxu0 %vm1225_vm3, %v2085_v33  ;;  %v1846_v37 = vld [vmem:[#allocation5 + $0xc] sm:$0xf] }
 0xbb5   : > { %v2234_v38 = vsel %vm1475_vm6, %v1846_v37, 0  ;;  %3192 = vmatprep.mubr.msk.bf16.mxu0 %vm3953_vm0, %v3952_v0  ;;  %v3415_v37 = vld [vmem:[%s5139_s23 + $0x10] sm:$0xff]  }
 0xbb6   : > { %3191 = vmatpush3.bf16.msra.mxu0 %v2234_v38  ;;  %v2086_v39 = vpack.c.bf16 %v2082_v35, %v2082_v35  ;;  %v3416_v38 = vld [vmem:[%s5139_s23 + $0x18] sm:$0xff]  }
 0xbb7   : > { %v3450_v51 = vpop.eup %3449  ;;  %3204 = vmatprep.subr.bf16.mxu0 %v3952_v0 }
 0xbb8   : > { %v2083_v41 = vmul.f32 %v3450_v51, %v3442_v21  ;;  %v1845_v42 = vld [vmem:[#allocation5 + $0x8] sm:$0xf]  ;;  %2090 = vst.msk [vmem:[%s4782_s20 + $0x8] sm:$0xf] %vm990_vm2, %v2086_v39 }
 0xbb9   : > { %v2188_v43 = vsel %vm1475_vm6, %v1845_v42, 0 }
 0xbba   : > { %3185 = vmatpush3.bf16.msra.mxu1 %v2188_v43  ;;  %v2087_v44 = vpack.c.bf16 %v2083_v41, %v2083_v41 }
 0xbbb   : > { %3196 = vmatprep.subr.bf16.mxu1 %v3952_v0 }
 0xbbc   : > { %2091 = vst.msk [vmem:[%s4782_s20 + $0xc] sm:$0xf] %vm990_vm2, %v2087_v44  ;;  %3193 = vmatmul.mubr.msk.bf16.vlgmr.msra.gmra.mrb[40].mxu0 %vm1225_vm3, %v2087_v44 }
 0xbbd   : > { %3187 = vmatmul.mubr.msk.bf16.vlgmr.msra.gmra.mrb[36].mxu1 %vm1225_vm3, %v2086_v39  ;;  %3208 = vmatprep.mubr.msk.bf16.mxu0 %vm3953_vm0, %v3952_v0  ;;  %v2978_v39 = vld [vmem:[%s5140_s16] ss:$0 sm:$0xff] }
 0xbbe   : > { %3200 = vmatprep.mubr.msk.bf16.mxu1 %vm3953_vm0, %v3952_v0  ;;  %3197 = vmatpush3.bf16.msra.mxu1 %v3409_v11 }
 0xbbf   : > { %3198 = vmatprep.subr.bf16.mxu1 %v3952_v0  ;;  %3205 = vmatpush3.bf16.msra.mxu0 %v3411_v7 }
 0xbc0   : > { %3206 = vmatprep.subr.bf16.mxu0 %v3952_v0 }
 0xbc2   : > { %3199 = vmatpush3.bf16.msra.mxu1 %v3410_v49 }
 0xbc3   : > { %3212 = vmatprep.subr.bf16.mxu1 %v3952_v0  ;;  %3207 = vmatpush3.bf16.msra.mxu0 %v3412_v24 }
 0xc22   : > { %v2132_v45 = vpop.f32.mrb[32].mxu1 }
 0xc23   : > { %v3176_v46 = vpop.f32.mrb[33].mxu1 }
 0xc24   : > { %v2135_v47 = vpop.f32.mrb[34].mxu1 }
 0xc25   : > { %v3177_v48 = vpop.f32.mrb[35].mxu1 }
 0xc87   : > { %v2178_v19 = vpop.f32.mrb[36].mxu0 }
 0xc88   : > { %2277 = vrot.lane.b32.xlu1 %v2178_v19, %s3963_s12  ;;  %v3182_v18 = vpop.f32.mrb[37].mxu0  ;;  %s3775_s12 = sshll.u32 %s3965_s19, 4  ;;  %s3776_s12 = int_to_ptr.vmem [resolvable:$false] %s3775_s12 }
 0xc89   : > { %v2181_v50 = vpop.f32.mrb[38].mxu0 }
 0xc8a   : > { %v3183_v52 = vpop.f32.mrb[39].mxu0 }
 0xc8f   : > { %v2270_v3 = vpop.f32.mrb[40].mxu0 }
 0xc90   : > { %v2224_v53 = vpop.f32.mrb[36].mxu1  ;;  %2285 = vrot.lane.b32.xlu1 %v2270_v3, %s5136_s6  ;;  %v3194_v54 = vpop.f32.mrb[41].mxu0  ;;  %s4875_s6 = scalar_lea.hbm %s5143_s27, %s3000_s2 }
 0xc91   : > { %2281 = vrot.lane.b32.xlu0 %v2224_v53, %s5137_s10  ;;  %v3188_v55 = vpop.f32.mrb[37].mxu1  ;;  %v2273_v56 = vpop.f32.mrb[42].mxu0  ;;  %s2598_s10 = sshll.u32 %s4634_s5, 4  ;;  %s4878_s10 = int_to_ptr.vmem [resolvable:$true] %s2598_s10 }
 0xc92   : > { %v2227_v57 = vpop.f32.mrb[38].mxu1  ;;  %v3195_v58 = vpop.f32.mrb[43].mxu0  ;;  %s3771_s16 = scalar_lea.vmem %s4878_s10, 256  ;;  %p3778_p13 = scmp.lt.s32.totalorder %s4878_s10, %s3776_s12 }
 0xc93   : > { %v3189_v59 = vpop.f32.mrb[39].mxu1  ;;  %p3772_p11 = scmp.ne.s32.totalorder %s4878_s10, %s3771_s16 }
 0xc95   : > { %p3773_p2 = pnand %p3772_p11, %p5145_p5 }
 0xc97   : > { %p3774_p4 = pneg %p3773_p2 }
 0xcfa   : > { %v2278_v60 = vpop.permute.xlu1 %2277 }
 0xcfb   : > { %v2288_v61 = vsel %vm1225_vm3, %v2132_v45, %v2278_v60 }
 0xd02   : > { %v2286_v63 = vpop.permute.xlu1 %2285 }
 0xd03   : > { %v2282_v62 = vpop.permute.xlu0 %2281 }
 0xd04   : > { %v2289_v1 = vsel %vm1670_vm7, %v2288_v61, %v2282_v62 }
 0xd05   : > { %v2290_v4 = vsel %vm1672_vm8, %v2289_v1, %v2286_v63 }
 0xd06   : > { %v2291_v5 = vpack.c.bf16 %v2290_v4, %v2290_v4 }
 0xd08   : > { %3201 = vmatmul.mubr.msk.bf16.vlgmr.msra.gmra.mrb[40].mxu1 %vm945_vm1, %v2291_v5 }
 0xd09   : > { %3220 = vmatprep.mubr.msk.bf16.mxu1 %vm3953_vm0, %v3952_v0 }
 0xddb   : > { %v2350_v8 = vpop.f32.mrb[40].mxu1 }
 0xddc   : > { %v2351_v9 = vadd.f32 %v2350_v8, %v2300_v6  ;;  %v3202_v10 = vpop.f32.mrb[41].mxu1 }
 0xddd   : > { %v2353_v12 = vpop.f32.mrb[42].mxu1 }
 0xdde   : > { %v3203_v13 = vpop.f32.mrb[43].mxu1  ;;  %v2356_v14 = vadd.f32 %v2351_v9, %v4711_v2  ;;  %v3413_v2 = vld [vmem:[%s5139_s23] sm:$0xff]  }
 0xddf   : > { %3213 = vmatpush3.bf16.msra.mxu1 %v3413_v2 }
 0xde0   : > { %v2358_v15 = vsel %vm945_vm1, %v2356_v14, 0.0  ;;  %3214 = vmatprep.subr.bf16.mxu1 %v3952_v0 }
 0xde1   : > { %2359 = vadd.xlane.f32.xlu0 %v2358_v15 }
 0xde3   : > { %3215 = vmatpush3.bf16.msra.mxu1 %v3414_v25 }
 0xde4   : > { %3216 = vmatprep.subr.bf16.mxu1 %v3952_v0 }
 0xde7   : > { %3217 = vmatpush3.bf16.msra.mxu1 %v3415_v37 }
 0xde8   : > { %3218 = vmatprep.subr.bf16.mxu1 %v3952_v0  ;;  %v2982_v0 = vld [vmem:[%s5141_s29] ss:$0 sm:$0xff]  ;;  %s3777_s29 = scalar_lea.vmem %s3776_s12, 512 }
 0xde9   : > { %p3779_p8 = scmp.lt.s32.totalorder %s3777_s29, %s3771_s16 }
 0xdeb   : > { %3219 = vmatpush3.bf16.msra.mxu1 %v3416_v38  ;;  %p3780_p3 = por %p3779_p8, %p3778_p13 }
 0xded   : > { %p3781_p7 = pnand %p3780_p3, %p3774_p4 }
 0xe6e   : > { %v2360_v17 = vpop.xlane.xlu0 %2359 }
 0xe6f   : > { %v2361_v20 = vmul.f32 0.03125, %v2360_v17 }
 0xe71   : > { %v2362_v21 = vsub.f32 %v2356_v14, %v2361_v20 }
 0xe73   : > { %v2363_v22 = vmul.f32 %v2362_v21, %v2362_v21 }
 0xe75   : > { %v2364_v23 = vsel %vm945_vm1, %v2363_v22, 0.0 }
 0xe76   : > { %2365 = vadd.xlane.f32.xlu1 %v2364_v23 }
 0xf03   : > { %v2366_v26 = vpop.xlane.xlu1 %2365 }
 0xf04   : > { %v2367_v27 = vmul.f32 0.03125, %v2366_v26 }
 0xf06   : > { %v2368_v36 = vadd.f32 1e-05, %v2367_v27 }
 0xf08   : > { %3451 = vrsqrt.f32 %v2368_v36 }
 0xf12   : > { %v3452_v30 = vpop.eup %3451 }
 0xf13   : > { %v2370_v31 = vmul.f32 %v3452_v30, %v2362_v21 }
 0xf15   : > { %v2375_v33 = vmul.f32 %v2374_v29, %v2370_v31 }
 0xf17   : > { %v2380_v34 = vadd.f32 %v2379_v32, %v2375_v33 }
 0xf19   : > { %v2381_v35 = vpack.c.bf16 %v2380_v34, %v2380_v34 }
 0xf1b   : > { %3209 = vmatmul.mubr.msk.bf16.vlgmr.msra.gmra.mrb[44].mxu0 %vm945_vm1, %v2381_v35 }
 0xfee   : > { %v2442_v51 = vpop.f32.mrb[44].mxu0 }
 0xfef   : > { %v2443_v41 = vadd.f32 %v2978_v39, %v2442_v51  ;;  %v3210_v42 = vpop.f32.mrb[45].mxu0 }
 0xff0   : > { %v2445_v43 = vpop.f32.mrb[46].mxu0 }
 0xff1   : > { %v2448_v44 = vmax.f32 %v2443_v41, 0.0  ;;  %v3211_v45 = vpop.f32.mrb[47].mxu0 }
 0xff3   : > { %v2449_v46 = vpack.c.bf16 %v2448_v44, %v2448_v44 }
 0xff5   : > { %3221 = vmatmul.mubr.msk.bf16.vlgmr.msra.gmra.mrb[44].mxu1 %vm2489_vm11, %v2449_v46 }
0x10c8   : > { %v2527_v47 = vpop.f32.mrb[44].mxu1 }
0x10c9   : > { %v2528_v48 = vadd.f32 %v2982_v0, %v2527_v47  ;;  %v3222_v11 = vpop.f32.mrb[45].mxu1 }
0x10ca   : > { %v2530_v49 = vpop.f32.mrb[46].mxu1 }
0x10cb   : > { %v3223_v19 = vpop.f32.mrb[47].mxu1  ;;  %v2533_v18 = vadd.f32 %v2528_v48, %v2380_v34 }
0x10cd   : > { %v2535_v50 = vsel %vm945_vm1, %v2533_v18, 0.0 }
0x10ce   : > { %2536 = vadd.xlane.f32.xlu0 %v2535_v50 }
0x115b   : > { %v2537_v52 = vpop.xlane.xlu0 %2536 }
0x115c   : > { %v2538_v3 = vmul.f32 0.03125, %v2537_v52 }
0x115e   : > { %v4864_v53 = vsub.f32 %v2533_v18, %v2538_v3 }
0x1160   : > { %v2540_v54 = vmul.f32 %v4864_v53, %v4864_v53 }
0x1162   : > { %v2541_v55 = vsel %vm945_vm1, %v2540_v54, 0.0 }
0x1163   : > { %2542 = vadd.xlane.f32.xlu0 %v2541_v55 }
0x1164   : > { %3784 = shalt.err (!%p3781_p7)
}
0x1165   : > { %s3785_s5 = scalar_lea.hbm %s4875_s6, 256  ;;  %s3789_s27 = scalar_lea.hbm %s5144_s18, 512 }
0x1166   : > { %p3786_p12 = scmp.ne.s32.totalorder %s4875_s6, %s3785_s5  ;;  %p3790_p10 = scmp.lt.u32.totalorder %s4875_s6, %s5144_s18 }
0x1167   : > { %p3791_p0 = scmp.lt.u32.totalorder %s3789_s27, %s3785_s5  ;;  %p3793_p11 = scmp.lt.u32.totalorder %s3785_s5, %s4875_s6 }
0x1168   : > { %p3787_p9 = pnand %p3786_p12, %p5145_p5 }
0x1169   : > { %p3792_p1 = por %p3791_p0, %p3790_p10 }
0x116a   : > { %p3788_p6 = pneg %p3787_p9 }
0x116b   : > { %p3794_p2 = por %p3793_p11, %p3792_p1 }
0x116d   : > { %p3795_p4 = pnand %p3794_p2, %p3788_p6 }
0x116f   : > { %3798 = shalt.err (!%p3795_p4)
}
0x1170   : > { %s3966_s16 = smov 64   ;;  %s3967_s29 = smov 4  }
0x1171   : > { %3261 = dma.vmem_to_hbm [thread:$0]  (%p5145_p5), %s4878_s10, 256, %s4875_s6, %s2565_s17, %s3966_s16, %s3966_s16, %s3967_s29  }
0x1172   : > { %s5146_s21 = sld [smem:[#allocation61_spill]]  ;;  %s2615_s19 = sshll.u32 %s4782_s20, 4  ;;  %s4915_s19 = int_to_ptr.vmem [resolvable:$true] %s2615_s19 }
0x1173   : > { %s3799_s12 = scalar_lea.vmem %s4915_s19, 256  ;;  %s3968_s1 = smov [#allocation27]  }
0x1174   : > { %p3800_p13 = scmp.ne.s32.totalorder %s4915_s19, %s3799_s12  ;;  %s3803_s7 = sshll.u32 %s3968_s1, 4  ;;  %s3804_s7 = int_to_ptr.vmem [resolvable:$false] %s3803_s7 }
0x1175   : > { %s3805_s6 = scalar_lea.vmem %s3804_s7, 512  ;;  %p3806_p7 = scmp.lt.s32.totalorder %s4915_s19, %s3804_s7 }
0x1176   : > { %p3801_p8 = pnand %p3800_p13, %p5145_p5  ;;  %p3807_p12 = scmp.lt.s32.totalorder %s3805_s6, %s3799_s12 }
0x1178   : > { %s4912_s27 = scalar_lea.hbm %s5146_s21, %s3000_s2  ;;  %p3802_p3 = pneg %p3801_p8 }
0x1179   : > { %p3808_p9 = por %p3807_p12, %p3806_p7 }
0x117b   : > { %p3809_p6 = pnand %p3808_p9, %p3802_p3 }
0x117d   : > { %3812 = shalt.err (!%p3809_p6)
}
0x117e   : > { %s3813_s20 = scalar_lea.hbm %s4912_s27, 256  ;;  %s3817_s1 = scalar_lea.hbm %s5146_s21, 512 }
0x117f   : > { %p3814_p10 = scmp.ne.s32.totalorder %s4912_s27, %s3813_s20  ;;  %p3818_p11 = scmp.lt.u32.totalorder %s4912_s27, %s5146_s21 }
0x1180   : > { %p3819_p2 = scmp.lt.u32.totalorder %s3817_s1, %s3813_s20  ;;  %p3821_p13 = scmp.lt.u32.totalorder %s3813_s20, %s4912_s27 }
0x1181   : > { %p3815_p0 = pnand %p3814_p10, %p5145_p5 }
0x1182   : > { %p3820_p4 = por %p3819_p2, %p3818_p11 }
0x1183   : > { %p3816_p1 = pneg %p3815_p0 }
0x1184   : > { %p3822_p8 = por %p3821_p13, %p3820_p4 }
0x1186   : > { %p3823_p3 = pnand %p3822_p8, %p3816_p1 }
0x1188   : > { %3826 = shalt.err (!%p3823_p3)
}
0x1189   : > { %3262 = dma.vmem_to_hbm [thread:$0]  (%p5145_p5), %s4915_s19, 256, %s4912_s27, %s2565_s17, %s3966_s16, %s3966_s16, %s3967_s29  }
0x118a   : > { %s5147_s6 = sld [smem:[#allocation58_spill]]  ;;  %s2991_s0 = sshll.u32 %s5142_s4, 7 }
0x118b   : > { %s5148_s20 = sshll.u32 %s4464_s14, 3  ;;  %s5149_s19 = sld [smem:[#allocation59_spill]] }
0x118c   : > { %s898_s17 = scalar_lea.vmem [#allocation24], %s5148_s20  ;;  %s2560_s10 = scalar_lea.sflag [#allocation8], %s4464_s14 }
0x118d   : > { %s2584_s16 = sshll.u32 %s898_s17, 4  ;;  %s3969_s4 = smov [#allocation24]   ;;  %s4957_s16 = int_to_ptr.vmem [resolvable:$true] %s2584_s16 }
0x118e   : > { %s3827_s1 = scalar_lea.vmem %s4957_s16, 128  ;;  %s3831_s5 = sshll.u32 %s3969_s4, 4  ;;  %s3832_s5 = int_to_ptr.vmem [resolvable:$false] %s3831_s5 }
0x118f   : > { %p3828_p7 = scmp.ne.s32.totalorder %s4957_s16, %s3827_s1  ;;  %s3833_s7 = scalar_lea.vmem %s3832_s5, 256 }
0x1190   : > { %v2534_v59 = vld [vmem:[%s5147_s6] sm:$0x3]  ;;  %p3834_p6 = scmp.lt.s32.totalorder %s4957_s16, %s3832_s5  ;;  %p3835_p10 = scmp.lt.s32.totalorder %s3833_s7, %s3827_s1 }
0x1191   : > { %v2551_v60 = vrot.slane %v2534_v59, %v4551_v16  ;;  %v2556_v63 = vrot.slane %v2534_v59, %v4685_v40  ;;  %s4955_s2 = scalar_lea.hbm %s5149_s19, %s2991_s0  ;;  %p3829_p12 = pnand %p3828_p7, %p5145_p5 }
0x1192   : > { %p3836_p0 = por %p3835_p10, %p3834_p6 }
0x1193   : > { %p3830_p9 = pneg %p3829_p12 }
0x1195   : > { %p3837_p1 = pnand %p3836_p0, %p3830_p9 }
0x11f0   : > { %v2543_v56 = vpop.xlane.xlu0 %2542 }
0x11f1   : > { %v2544_v57 = vmul.f32 0.03125, %v2543_v56 }
0x11f3   : > { %v2545_v58 = vadd.f32 1e-05, %v2544_v57 }
0x11f5   : > { %3453 = vrsqrt.f32 %v2545_v58 }
0x11ff   : > { %v3454_v61 = vpop.eup %3453 }
0x1200   : > { %v2547_v62 = vmul.f32 %v3454_v61, %v4864_v53 }
0x1202   : > { %v2552_v1 = vmul.f32 %v2551_v60, %v2547_v62 }
0x1204   : > { %v2557_v4 = vadd.f32 %v2556_v63, %v2552_v1 }
0x1206   : > { %2558 = vst.msk [vmem:[%s898_s17] sm:$0xff] %vm945_vm1, %v2557_v4 }
0x1207   : > { %3840 = shalt.err (!%p3837_p1)
}
0x1208   : > { %s3841_s14 = scalar_lea.hbm %s4955_s2, 128  ;;  %s3845_s6 = scalar_lea.hbm %s5149_s19, 256 }
0x1209   : > { %p3842_p11 = scmp.ne.s32.totalorder %s4955_s2, %s3841_s14  ;;  %p3846_p13 = scmp.lt.u32.totalorder %s4955_s2, %s5149_s19 }
0x120a   : > { %p3847_p8 = scmp.lt.u32.totalorder %s3845_s6, %s3841_s14  ;;  %p3849_p7 = scmp.lt.u32.totalorder %s3841_s14, %s4955_s2 }
0x120b   : > { %p3843_p2 = pnand %p3842_p11, %p5145_p5 }
0x120c   : > { %p3848_p3 = por %p3847_p8, %p3846_p13 }
0x120d   : > { %p3844_p4 = pneg %p3843_p2 }
0x120e   : > { %p3850_p12 = por %p3849_p7, %p3848_p3 }
0x1210   : > { %p3851_p9 = pnand %p3850_p12, %p3844_p4 }
0x1212   : > { %3854 = shalt.err (!%p3851_p9)
}
0x1213   : > { %3260 = dma.vmem_to_hbm [thread:$0]  (%p5145_p5), %s4957_s16, 128, %s4955_s2, %s2560_s10  }
0x1214 PF: > { %s5150_s17 = sld [smem:[#allocation37_spill]]  ;;  %s5151_s29 = sld [smem:[#allocation42_spill]] }
0x1215   : > { %p5153_p10 = scmp.ge.s32.totalorder %s3937_s28, 2 }
0x121a   : > { %s2630_s27 = sand.u32 1, %s5150_s17   ;;  %p5152_p6 = scmp.ne.s32.totalorder %s5151_s29, 0 }
0x121b   : > { %s2631_s1 = scalar_lea.sflag [#allocation8], %s2630_s27 }
0x121c   : > { %p3302_p0 = pnand %p5153_p10, %p5152_p6 }
0x121e   : > { %3908 = dma.done.wait (!%p3302_p0), %s2631_s1, 128  }
0x121f   : > { %3910 = vsyncadd (!%p3302_p0), %s2631_s1, 4294967168  ;;  %s5154_s4 = sadd.s32 4294967294, %s3937_s28  }
0x1220   : > { %s2639_s5 = sand.u32 1, %s5154_s4  }
0x1221   : > { %s2640_s7 = scalar_lea.sflag [#allocation26], %s2639_s5 }
0x1222   : > { %3912 = dma.done.wait (!%p3302_p0), %s2640_s7, 512  }
0x1223   : > { %3914 = vsyncadd (!%p3302_p0), %s2640_s7, 4294966784  ;;  %s50_s28 = sadd.s32 1, %s3937_s28   ;;  %s5155_s22 = sld [smem:[#allocation38_spill]] }
0x1224   : > { %p47_p5 = scmp.ge.s32.totalorder %s50_s28, 4   ;;  %s5156_s26 = sld [smem:[#allocation41_spill]] }
0x1225   : > { %s5157_s16 = sld [smem:[#allocation40_spill]]  ;;  %s5158_s2 = smov %s3921_s25 }
0x1226   : > { %s5160_s27 = smov %s3933_s3  ;;  %49 = sbr.rel (!%p47_p5) target bundleno = 35 (0x23), region = 257 }
0x1229   : > { %s5159_s25 = smov %s5155_s22 }
0x122b   : > { %s5161_s3 = smov %s5157_s16 }
0x122d   :  { %2654 = vsyncpa [#allocation7], 1 }
0x122e   :  { %2656 = vsyncpa [#allocation7 + $0x1], 1 }
0x122f   :  { %2657 = vsyncpa [#allocation10], 1 }
0x1230   :  { %2659 = vsyncpa [#allocation10 + $0x1], 1 }
0x1231   :  { %2660 = vsyncpa [#allocation13], 1 }
0x1232   :  { %2662 = vsyncpa [#allocation13 + $0x1], 1 }
0x1233   :  { %2663 = vsyncpa [#allocation16], 1 }
0x1234   :  { %2664 = vsyncpa [#allocation19], 1 }
0x1235   :  { %2665 = vsyncpa [#allocation22], 1 }
0x1236   :  { %2666 = vsyncpa [#allocation8], 1 }
0x1237   :  { %2668 = vsyncpa [#allocation8 + $0x1], 1 }
0x1238   :  { %2669 = vsyncpa [#allocation26], 1 }
0x1239   :  { %2671 = vsyncpa [#allocation26 + $0x1], 1 }

</bundles_post_ra>
